<compile_context>
chip_gen: v7x
topology: tpu7x:2x2x1
jax: 0.10.0
libtpu: 0.0.40
codegen_flags: <defaults>
</compile_context>

<pallas_src>
import jax
import jax.numpy as jnp
from jax.experimental import pallas as pl
from jax.experimental.pallas import tpu as pltpu

IN_CHANNELS = 3          # PointNet-style 3D points
C1, C2, C3 = 64, 128, 1024


# --------------------------------------------------------------------------
# Shared per-point MLP (rows = points on sublanes, channels on lanes).
# --------------------------------------------------------------------------
def _point_mlp(xf, w1, b1, w2_bf16, b2, w3_bf16, b3):
    """(R, 3) f32 point rows -> (R, C3) f32 per-point features."""
    # Layer 1 (K = 3): VPU broadcast-FMA; a 3-wide MXU pass would waste a full
    # systolic push while VALU slots idle.
    h1 = b1 + xf[:, 0:1] * w1[0:1, :]
    for d in range(1, IN_CHANNELS):              # static Python loop
        h1 = h1 + xf[:, d:d + 1] * w1[d:d + 1, :]
    h1 = jnp.maximum(h1, 0.0)

    # Layers 2 & 3 on the MXU: bf16 operands, f32 accumulation, f32 bias/ReLU.
    h2 = jnp.dot(h1.astype(jnp.bfloat16), w2_bf16,
                 preferred_element_type=jnp.float32) + b2
    h2 = jnp.maximum(h2, 0.0)
    h3 = jnp.dot(h2.astype(jnp.bfloat16), w3_bf16,
                 preferred_element_type=jnp.float32) + b3
    return h3


def _make_fused_kernel(TB, N, NC):
    """src + tgt point clouds -> state tile (TB, 2*C3) in one matmul chain."""
    n_chunks = N // NC

    def kernel(src_ref, tgt_ref, w1_ref, b1_ref, w2_ref, b2_ref,
               w3_ref, b3_ref, state_ref):
        w1, b1 = w1_ref[...], b1_ref[...]
        w2, b2 = w2_ref[...], b2_ref[...]
        w3, b3 = w3_ref[...], b3_ref[...]

        acc = None                                    # (2*TB, C3) running max
        for c in range(n_chunks):                     # static N-chunk loop
            lo = c * NC
            xs = src_ref[:, lo:lo + NC, :].reshape(TB * NC, IN_CHANNELS)
            xt = tgt_ref[:, lo:lo + NC, :].reshape(TB * NC, IN_CHANNELS)
            # One matmul chain for both clouds: rows = [src | tgt].
            xf = jnp.concatenate([xs, xt], axis=0)
            h3 = _point_mlp(xf, w1, b1, w2, b2, w3, b3)
            chunk_max = jnp.max(h3.reshape(2 * TB, NC, C3), axis=1)
            acc = chunk_max if acc is None else jnp.maximum(acc, chunk_max)

        # Lane-dense stores (column offset C3 = 1024 is 128-aligned).
        state_ref[:, :C3] = acc[:TB, :]
        state_ref[:, C3:] = acc[TB:, :]

    return kernel


def _make_single_kernel(TB, N, NC):
    """BENCHMARK path: embed src only; tgt embedding copied into state."""
    n_chunks = N // NC

    def kernel(src_ref, tgt_emb_ref, w1_ref, b1_ref, w2_ref, b2_ref,
               w3_ref, b3_ref, state_ref):
        w1, b1 = w1_ref[...], b1_ref[...]
        w2, b2 = w2_ref[...], b2_ref[...]
        w3, b3 = w3_ref[...], b3_ref[...]

        acc = None
        for c in range(n_chunks):
            lo = c * NC
            xf = src_ref[:, lo:lo + NC, :].reshape(TB * NC, IN_CHANNELS)
            h3 = _point_mlp(xf, w1, b1, w2, b2, w3, b3)
            chunk_max = jnp.max(h3.reshape(TB, NC, C3), axis=1)
            acc = chunk_max if acc is None else jnp.maximum(acc, chunk_max)

        state_ref[:, :C3] = acc
        state_ref[:, C3:] = tgt_emb_ref[...].astype(state_ref.dtype)

    return kernel


# --------------------------------------------------------------------------
# Tiling heuristics.
# --------------------------------------------------------------------------
def _pick_batch_tile(B, N, target_rows=2048):
    """Batch tile TB dividing B; TB % 8 == 0 or TB == B so the (TB, 2048)
    output block obeys the (8, 128) rule.  Prefers the largest tile with
    TB*N <= target_rows; if nothing fits, falls back to the SMALLEST valid
    tile (bounded VMEM) rather than the whole batch.  For B >= 16 forces at
    least 2 grid steps so the 'parallel' axis can use both v7x TensorCores."""
    divisors = [d for d in range(1, B + 1) if B % d == 0]
    cand = [d for d in divisors if d % 8 == 0 or d == B]
    min_steps = 2 if B >= 16 else 1
    stepped = [d for d in cand if B // d >= min_steps]
    if stepped:
        cand = stepped
    fit = [d for d in cand if d * N <= target_rows]
    return max(fit) if fit else min(cand)


def _pick_n_chunk(N, TB, max_chunk_rows=1024):
    """N-chunk NC dividing N bounding the per-chunk h3 intermediate to
    ~max_chunk_rows*4KiB per cloud.  Prefers NC % 8 == 0 (or NC == N) so the
    (TB, NC, 3) -> (TB*NC, 3) reshape stays sublane-aligned."""
    divisors = [d for d in range(1, N + 1) if N % d == 0]
    pref = [d for d in divisors if d % 8 == 0 or d == N]
    fit = [d for d in pref if TB * d <= max_chunk_rows]
    if fit:
        return max(fit)
    fit_any = [d for d in divisors if TB * d <= max_chunk_rows]
    return max(fit_any) if fit_any else 1


def _compiler_params():
    return pltpu.CompilerParams(
        dimension_semantics=("parallel",),     # batch tiles are independent
        vmem_limit_bytes=48 << 20)             # safe on v7x (64 MiB physical)


# --------------------------------------------------------------------------
# Forward.
# --------------------------------------------------------------------------
def state_embed_3d_forward(src, tgt, params):
    """src: (B, N, 3); tgt: (B, N, 3) or a precomputed (B, 1024) embedding.
    Returns (state (B, 2048), emb_tgt (B, 1024))."""
    B, N, D = src.shape
    assert D == IN_CHANNELS
    w1, b1, w2, b2, w3, b3 = params
    w2b, w3b = w2.astype(jnp.bfloat16), w3.astype(jnp.bfloat16)

    TB = _pick_batch_tile(B, N)
    nb = B // TB
    NC = _pick_n_chunk(N, TB)

    x_spec = pl.BlockSpec((TB, N, IN_CHANNELS), lambda b: (b, 0, 0))
    w_specs = [pl.BlockSpec(a.shape, lambda b: (0, 0))
               for a in (w1, b1, w2b, b2, w3b, b3)]
    state_spec = pl.BlockSpec((TB, 2 * C3), lambda b: (b, 0))

    if tgt.ndim == 3:
        state = pl.pallas_call(
            _make_fused_kernel(TB, N, NC),
            out_shape=jax.ShapeDtypeStruct((B, 2 * C3), jnp.float32),
            grid_spec=pltpu.PrefetchScalarGridSpec(
                num_scalar_prefetch=0,
                grid=(nb,),
                in_specs=[x_spec, x_spec] + w_specs,
                out_specs=state_spec),
            compiler_params=_compiler_params(),
        )(src, tgt, w1, b1, w2b, b2, w3b, b3)
        emb_tgt = state[:, C3:]                # zero-cost view of the kernel output
        return state, emb_tgt

    # BENCHMARK path: tgt is already a (B, 1024) embedding -> concat fused
    # into the kernel's lane-dense store (no XLA concatenate round trip).
    tgt_spec = pl.BlockSpec((TB, C3), lambda b: (b, 0))
    state = pl.pallas_call(
        _make_single_kernel(TB, N, NC),
        out_shape=jax.ShapeDtypeStruct((B, 2 * C3), jnp.float32),
        grid_spec=pltpu.PrefetchScalarGridSpec(
            num_scalar_prefetch=0,
            grid=(nb,),
            in_specs=[x_spec, tgt_spec] + w_specs,
            out_specs=state_spec),
        compiler_params=_compiler_params(),
    )(src, tgt, w1, b1, w2b, b2, w3b, b3)
    return state, tgt


# --------------------------------------------------------------------------
# Params / reference / test.
# --------------------------------------------------------------------------
def init_params(key):
    """Deterministic synthetic Conv1d params.  PyTorch Conv1d weight shape is
    (out, in, 1); we store the transposed (in, out) matmul form directly.
    Biases kept 2D (1, out) for lane layout."""
    ks = jax.random.split(key, 6)
    scale = 0.05
    w1 = scale * jax.random.normal(ks[0], (IN_CHANNELS, C1), jnp.float32)
    b1 = scale * jax.random.normal(ks[1], (1, C1), jnp.float32)
    w2 = scale * jax.random.normal(ks[2], (C1, C2), jnp.float32)
    b2 = scale * jax.random.normal(ks[3], (1, C2), jnp.float32)
    w3 = scale * jax.random.normal(ks[4], (C2, C3), jnp.float32)
    b3 = scale * jax.random.normal(ks[5], (1, C3), jnp.float32)
    return (w1, b1, w2, b2, w3, b3)


def _reference_forward(src, tgt, params):
    """Pure-JAX f32 reference."""
    w1, b1, w2, b2, w3, b3 = params

    def emb(x):
        h1 = jnp.maximum(jnp.einsum("bnd,dc->bnc", x, w1) + b1, 0.0)
        h2 = jnp.maximum(jnp.einsum("bnc,ce->bne", h1, w2) + b2, 0.0)
        h3 = jnp.einsum("bne,ef->bnf", h2, w3) + b3
        return jnp.max(h3, axis=1)

    es = emb(src)
    et = emb(tgt) if tgt.ndim == 3 else tgt
    return jnp.concatenate((es, et), axis=-1), et


def _check(src, tgt, params, atol=1e-2, rtol=1e-2):
    state, emb_tgt = state_embed_3d_forward(src, tgt, params)
    state = jax.block_until_ready(state)
    emb_tgt = jax.block_until_ready(emb_tgt)
    ref_state, ref_emb_tgt = _reference_forward(src, tgt, params)
    B = src.shape[0]
    assert state.shape == (B, 2 * C3), state.shape
    assert emb_tgt.shape == (B, C3), emb_tgt.shape
    assert jnp.allclose(state, ref_state, atol=atol, rtol=rtol), \
        float(jnp.max(jnp.abs(state - ref_state)))
    assert jnp.allclose(emb_tgt, ref_emb_tgt, atol=atol, rtol=rtol), \
        float(jnp.max(jnp.abs(emb_tgt - ref_emb_tgt)))
    return state, emb_tgt


if __name__ == "__main__":
    key = jax.random.PRNGKey(0)
    kp, ks, kt, ks2, kt2 = jax.random.split(key, 5)
    params = init_params(kp)

    # Main (fused) path: both src and tgt are point clouds.  Small shapes.
    B, N = 2, 16
    src = jax.random.normal(ks, (B, N, IN_CHANNELS), jnp.float32)
    tgt = jax.random.normal(kt, (B, N, IN_CHANNELS), jnp.float32)
    state, emb_tgt = _check(src, tgt, params)

    # BENCHMARK path: tgt is already a (B, 1024) embedding (concat fused).
    state_b, emb_tgt_b = state_embed_3d_forward(src, emb_tgt, params)
    state_b = jax.block_until_ready(state_b)
    ref_state_b, _ = _reference_forward(src, emb_tgt, params)
    assert state_b.shape == (B, 2 * C3), state_b.shape
    assert jnp.allclose(state_b, ref_state_b, atol=1e-2, rtol=1e-2)
    assert jnp.array_equal(emb_tgt_b, emb_tgt)

    # Multi-step grid + megacore-friendly tiling path (still small).
    B2, N2 = 16, 64
    src2 = jax.random.normal(ks2, (B2, N2, IN_CHANNELS), jnp.float32)
    tgt2 = jax.random.normal(kt2, (B2, N2, IN_CHANNELS), jnp.float32)
    _check(src2, tgt2, params)

    print("KERNEL_OK")
</pallas_src>

<mosaic_0001>
module attributes {stable_mosaic.version = 11 : i64} {
  func.func @kernel(%arg0: i32, %arg1: memref<2x16x3xf32, #tpu.memory_space<vmem>>, %arg2: memref<2x16x3xf32, #tpu.memory_space<vmem>>, %arg3: memref<3x64xf32, #tpu.memory_space<vmem>>, %arg4: memref<1x64xf32, #tpu.memory_space<vmem>>, %arg5: memref<64x128xbf16, #tpu.memory_space<vmem>>, %arg6: memref<1x128xf32, #tpu.memory_space<vmem>>, %arg7: memref<128x1024xbf16, #tpu.memory_space<vmem>>, %arg8: memref<1x1024xf32, #tpu.memory_space<vmem>>, %arg9: memref<2x2048xf32, #tpu.memory_space<vmem>>) attributes {dimension_semantics = [#tpu.dimension_semantics<parallel>], iteration_bounds = array<i64: 1>, scalar_prefetch = 0 : i64, scratch_operands = 0 : i64, tpu.core_type = #tpu.core_type<tc>, window_params = [{transform_indices = @transform_0, window_bounds = array<i64: 2, 16, 3>}, {transform_indices = @transform_1, window_bounds = array<i64: 2, 16, 3>}, {pipeline_mode = #tpu.pipeline_mode<synchronous>, transform_indices = @transform_2, window_bounds = array<i64: 3, 64>}, {pipeline_mode = #tpu.pipeline_mode<synchronous>, transform_indices = @transform_3, window_bounds = array<i64: 1, 64>}, {pipeline_mode = #tpu.pipeline_mode<synchronous>, transform_indices = @transform_4, window_bounds = array<i64: 64, 128>}, {pipeline_mode = #tpu.pipeline_mode<synchronous>, transform_indices = @transform_5, window_bounds = array<i64: 1, 128>}, {pipeline_mode = #tpu.pipeline_mode<synchronous>, transform_indices = @transform_6, window_bounds = array<i64: 128, 1024>}, {pipeline_mode = #tpu.pipeline_mode<synchronous>, transform_indices = @transform_7, window_bounds = array<i64: 1, 1024>}, {transform_indices = @transform_8, window_bounds = array<i64: 2, 2048>}]} {
    %c0 = arith.constant 0 : index
    %c0_0 = arith.constant 0 : index
    %0 = vector.load %arg3[%c0, %c0_0] : memref<3x64xf32, #tpu.memory_space<vmem>>, vector<3x64xf32>
    %c0_1 = arith.constant 0 : index
    %c0_2 = arith.constant 0 : index
    %1 = vector.load %arg4[%c0_1, %c0_2] : memref<1x64xf32, #tpu.memory_space<vmem>>, vector<1x64xf32>
    %c0_3 = arith.constant 0 : index
    %c0_4 = arith.constant 0 : index
    %2 = vector.load %arg5[%c0_3, %c0_4] : memref<64x128xbf16, #tpu.memory_space<vmem>>, vector<64x128xbf16>
    %c0_5 = arith.constant 0 : index
    %c0_6 = arith.constant 0 : index
    %3 = vector.load %arg6[%c0_5, %c0_6] : memref<1x128xf32, #tpu.memory_space<vmem>>, vector<1x128xf32>
    %c0_7 = arith.constant 0 : index
    %c0_8 = arith.constant 0 : index
    %4 = vector.load %arg7[%c0_7, %c0_8] : memref<128x1024xbf16, #tpu.memory_space<vmem>>, vector<128x1024xbf16>
    %c0_9 = arith.constant 0 : index
    %c0_10 = arith.constant 0 : index
    %5 = vector.load %arg8[%c0_9, %c0_10] : memref<1x1024xf32, #tpu.memory_space<vmem>>, vector<1x1024xf32>
    %c0_11 = arith.constant 0 : index
    %c0_12 = arith.constant 0 : index
    %c0_13 = arith.constant 0 : index
    %6 = vector.load %arg1[%c0_11, %c0_12, %c0_13] : memref<2x16x3xf32, #tpu.memory_space<vmem>>, vector<2x16x3xf32>
    %7 = vector.shape_cast %6 : vector<2x16x3xf32> to vector<32x3xf32>
    %c0_14 = arith.constant 0 : index
    %c0_15 = arith.constant 0 : index
    %c0_16 = arith.constant 0 : index
    %8 = vector.load %arg2[%c0_14, %c0_15, %c0_16] : memref<2x16x3xf32, #tpu.memory_space<vmem>>, vector<2x16x3xf32>
    %9 = vector.shape_cast %8 : vector<2x16x3xf32> to vector<32x3xf32>
    %10 = tpu.concatenate %7, %9 in 0 : vector<32x3xf32>, vector<32x3xf32> -> vector<64x3xf32>
    %11 = vector.extract_strided_slice %10 {offsets = [0, 0], sizes = [64, 1], strides = [1, 1]} : vector<64x3xf32> to vector<64x1xf32>
    %12 = vector.extract_strided_slice %0 {offsets = [0, 0], sizes = [1, 64], strides = [1, 1]} : vector<3x64xf32> to vector<1x64xf32>
    %13 = vector.broadcast %11 : vector<64x1xf32> to vector<64x64xf32>
    %14 = vector.broadcast %12 : vector<1x64xf32> to vector<64x64xf32>
    %15 = arith.mulf %13, %14 : vector<64x64xf32>
    %16 = vector.broadcast %1 : vector<1x64xf32> to vector<64x64xf32>
    %17 = arith.addf %16, %15 : vector<64x64xf32>
    %18 = vector.extract_strided_slice %10 {offsets = [0, 1], sizes = [64, 1], strides = [1, 1]} : vector<64x3xf32> to vector<64x1xf32>
    %19 = vector.extract_strided_slice %0 {offsets = [1, 0], sizes = [1, 64], strides = [1, 1]} : vector<3x64xf32> to vector<1x64xf32>
    %20 = vector.broadcast %18 : vector<64x1xf32> to vector<64x64xf32>
    %21 = vector.broadcast %19 : vector<1x64xf32> to vector<64x64xf32>
    %22 = arith.mulf %20, %21 : vector<64x64xf32>
    %23 = arith.addf %17, %22 : vector<64x64xf32>
    %24 = vector.extract_strided_slice %10 {offsets = [0, 2], sizes = [64, 1], strides = [1, 1]} : vector<64x3xf32> to vector<64x1xf32>
    %25 = vector.extract_strided_slice %0 {offsets = [2, 0], sizes = [1, 64], strides = [1, 1]} : vector<3x64xf32> to vector<1x64xf32>
    %26 = vector.broadcast %24 : vector<64x1xf32> to vector<64x64xf32>
    %27 = vector.broadcast %25 : vector<1x64xf32> to vector<64x64xf32>
    %28 = arith.mulf %26, %27 : vector<64x64xf32>
    %29 = arith.addf %23, %28 : vector<64x64xf32>
    %cst = arith.constant 0.000000e+00 : f32
    %30 = vector.broadcast %cst : f32 to vector<64x64xf32>
    %31 = arith.maximumf %29, %30 : vector<64x64xf32>
    %32 = arith.truncf %31 : vector<64x64xf32> to vector<64x64xbf16>
    %cst_17 = arith.constant dense<0.000000e+00> : vector<64x128xf32>
    %33 = tpu.matmul %32, %2, %cst_17 {dimension_numbers = #tpu.dot_dimension_numbers<[1], [0], [0], [1], [0, 0, 1, 1], [], []>} : vector<64x64xbf16>, vector<64x128xbf16>, vector<64x128xf32> -> vector<64x128xf32>
    %34 = vector.broadcast %3 : vector<1x128xf32> to vector<64x128xf32>
    %35 = arith.addf %33, %34 : vector<64x128xf32>
    %cst_18 = arith.constant 0.000000e+00 : f32
    %36 = vector.broadcast %cst_18 : f32 to vector<64x128xf32>
    %37 = arith.maximumf %35, %36 : vector<64x128xf32>
    %38 = arith.truncf %37 : vector<64x128xf32> to vector<64x128xbf16>
    %cst_19 = arith.constant dense<0.000000e+00> : vector<64x1024xf32>
    %39 = tpu.matmul %38, %4, %cst_19 {dimension_numbers = #tpu.dot_dimension_numbers<[1], [0], [0], [1], [0, 0, 1, 1], [], []>} : vector<64x128xbf16>, vector<128x1024xbf16>, vector<64x1024xf32> -> vector<64x1024xf32>
    %40 = vector.broadcast %5 : vector<1x1024xf32> to vector<64x1024xf32>
    %41 = arith.addf %39, %40 : vector<64x1024xf32>
    %42 = vector.shape_cast %41 : vector<64x1024xf32> to vector<4x16x1024xf32>
    %cst_20 = arith.constant dense<0xFF800000> : vector<4x1024xf32>
    %43 = vector.multi_reduction <maximumf>, %42, %cst_20 [1] : vector<4x16x1024xf32> to vector<4x1024xf32>
    %44 = vector.extract_strided_slice %43 {offsets = [0, 0], sizes = [2, 1024], strides = [1, 1]} : vector<4x1024xf32> to vector<2x1024xf32>
    %c0_21 = arith.constant 0 : index
    %c0_22 = arith.constant 0 : index
    %45 = vector.load %arg9[%c0_21, %c0_22] : memref<2x2048xf32, #tpu.memory_space<vmem>>, vector<2x1024xf32>
    tpu.vector_store %arg9[%c0_21, %c0_22], %44 {strides = array<i32>} : memref<2x2048xf32, #tpu.memory_space<vmem>>, vector<2x1024xf32>,
    %46 = vector.extract_strided_slice %43 {offsets = [2, 0], sizes = [2, 1024], strides = [1, 1]} : vector<4x1024xf32> to vector<2x1024xf32>
    %c0_23 = arith.constant 0 : index
    %c1024 = arith.constant 1024 : index
    %47 = vector.load %arg9[%c0_23, %c1024] : memref<2x2048xf32, #tpu.memory_space<vmem>>, vector<2x1024xf32>
    tpu.vector_store %arg9[%c0_23, %c1024], %46 {strides = array<i32>} : memref<2x2048xf32, #tpu.memory_space<vmem>>, vector<2x1024xf32>,
    return
  }
  func.func @transform_0(%arg0: i32) -> (i32, i32, i32) {
    %c0_i32 = arith.constant 0 : i32
    %c0_i32_0 = arith.constant 0 : i32
    %c0_i32_1 = arith.constant 0 : i32
    return %arg0, %c0_i32, %c0_i32_0 : i32, i32, i32
  }
  func.func @transform_1(%arg0: i32) -> (i32, i32, i32) {
    %c0_i32 = arith.constant 0 : i32
    %c0_i32_0 = arith.constant 0 : i32
    %c0_i32_1 = arith.constant 0 : i32
    return %arg0, %c0_i32, %c0_i32_0 : i32, i32, i32
  }
  func.func @transform_2(%arg0: i32) -> (i32, i32) {
    %c0_i32 = arith.constant 0 : i32
    %c0_i32_0 = arith.constant 0 : i32
    %c0_i32_1 = arith.constant 0 : i32
    return %c0_i32, %c0_i32_0 : i32, i32
  }
  func.func @transform_3(%arg0: i32) -> (i32, i32) {
    %c0_i32 = arith.constant 0 : i32
    %c0_i32_0 = arith.constant 0 : i32
    %c0_i32_1 = arith.constant 0 : i32
    return %c0_i32, %c0_i32_0 : i32, i32
  }
  func.func @transform_4(%arg0: i32) -> (i32, i32) {
    %c0_i32 = arith.constant 0 : i32
    %c0_i32_0 = arith.constant 0 : i32
    %c0_i32_1 = arith.constant 0 : i32
    return %c0_i32, %c0_i32_0 : i32, i32
  }
  func.func @transform_5(%arg0: i32) -> (i32, i32) {
    %c0_i32 = arith.constant 0 : i32
    %c0_i32_0 = arith.constant 0 : i32
    %c0_i32_1 = arith.constant 0 : i32
    return %c0_i32, %c0_i32_0 : i32, i32
  }
  func.func @transform_6(%arg0: i32) -> (i32, i32) {
    %c0_i32 = arith.constant 0 : i32
    %c0_i32_0 = arith.constant 0 : i32
    %c0_i32_1 = arith.constant 0 : i32
    return %c0_i32, %c0_i32_0 : i32, i32
  }
  func.func @transform_7(%arg0: i32) -> (i32, i32) {
    %c0_i32 = arith.constant 0 : i32
    %c0_i32_0 = arith.constant 0 : i32
    %c0_i32_1 = arith.constant 0 : i32
    return %c0_i32, %c0_i32_0 : i32, i32
  }
  func.func @transform_8(%arg0: i32) -> (i32, i32) {
    %c0_i32 = arith.constant 0 : i32
    %c0_i32_0 = arith.constant 0 : i32
    return %arg0, %c0_i32 : i32, i32
  }
}

</mosaic_0001>

<bundles_post_ra>
// kernel: tpu_custom_call.1
= control target key start
LH: loop header
LB: loop body
LE: loop exit
PB: predicated region body
PF: predicated region fallthrough
CT: control target
= control target key end

     0   :  { %13 = vsyncpa [#allocation3], 0  ;;  %s2162_s0 = inlined_call_operand.vmem [shape: f32[2,16,3], index: 0, kind: input, shape index: {}]   ;;  %s2163_s1 = inlined_call_operand.vmem [shape: f32[2,16,3], index: 1, kind: input, shape index: {}]   ;;  %s2164_s2 = inlined_call_operand.vmem [shape: f32[3,64], index: 2, kind: input, shape index: {}]   ;;  %s2165_s3 = inlined_call_operand.vmem [shape: f32[1,64], index: 3, kind: input, shape index: {}]   ;;  %s2166_s4 = inlined_call_operand.vmem [shape: bf16[64,128], index: 4, kind: input, shape index: {}]   ;;  %s2167_s5 = inlined_call_operand.vmem [shape: f32[1,128], index: 5, kind: input, shape index: {}]   ;;  %s2168_s6 = inlined_call_operand.hbm [shape: bf16[128,1024], index: 6, kind: input, shape index: {}]   ;;  %s2169_s7 = inlined_call_operand.vmem [shape: f32[1,1024], index: 7, kind: input, shape index: {}]   ;;  %s2170_s8 = inlined_call_operand.hbm [shape: f32[2,2048], index: 8, kind: output, shape index: {}]  }
   0x1   :  { %14 = vsyncpa [#allocation4], 0  ;;  %s1718_s27 = smov [#allocation2]   ;;  %s1670_s9 = scalar_lea.hbm %s2168_s6, 8192 }
   0x2   :  { %s32_s28 = sshll.u32 %s1718_s27, 4  ;;  %p1671_p0 = scmp.ne.s32.totalorder %s2168_s6, %s1670_s9  ;;  %s33_s28 = int_to_ptr.vmem [resolvable:$true] %s32_s28 }
   0x3   :  { %p1674_p1 = scmp.lt.u32.totalorder %s1670_s9, %s2168_s6 }
   0x5   :  { %p1676_p2 = pnand %p1674_p1, %p1671_p0 }
   0x7   :  { %1679 = shalt.err (!%p1676_p2)
}
   0x8   :  { %s1680_s14 = scalar_lea.vmem %s33_s28, 8192  ;;  %p1685_p4 = scmp.lt.s32.totalorder %s33_s28, %s33_s28 }
   0x9   :  { %p1681_p3 = scmp.ne.s32.totalorder %s33_s28, %s1680_s14  ;;  %p1686_p5 = scmp.lt.s32.totalorder %s1680_s14, %s1680_s14 }
   0xb   :  { %p1687_p6 = por %p1686_p5, %p1685_p4 }
   0xd   :  { %p1688_p7 = pnand %p1687_p6, %p1681_p3 }
   0xf   :  { %1691 = shalt.err (!%p1688_p7)
}
  0x10   :  { %s1719_s15 = smov 512   ;;  %s1720_s16 = smov 32  }
  0x11   :  { %38 = dma.hbm_to_vmem [thread:$0]  %s2168_s6, 8192, %s33_s28, [#allocation3], %s1719_s15, %s1719_s15, %s1720_s16  }
  0x12   :  { %1714 = dma.done.wait [#allocation3], 8192  }
  0x13   :  { %1715 = vsyncadd [#allocation3], 4294959104  ;;  %v1721_v0 = vmov 1   ;;  %v1722_v1 = vmov 0   ;;  %v123_v2 = vld [vmem:[%s2162_s0 + $0x10] sm:$0xff]  ;;  %v121_v3 = vld [vmem:[%s2162_s0] sm:$0xff]  ;;  %v169_v45 = vlaneseq }
  0x14   :  { %1656 = vset.pattern.permute.xlu0 %v1721_v0  ;;  %1655 = vset.pattern.permute.xlu1 %v1722_v1  ;;  %v124_v4 = vld [vmem:[%s2162_s0 + $0x18] sm:$0xff]  ;;  %v122_v5 = vld [vmem:[%s2162_s0 + $0x8] sm:$0xff]  ;;  %v1723_v6 = vmov 2   ;;  %v1666_v7 = vld [vmem:[%s2166_s4] sm:$0xff]   ;;  %vm341_vm0 = vcmask 523264   ;;  %vm1397_vm1 = vcmask 1041409  }
  0x15   :  { %824 = vmatprep.mubr.bf16.mxu1 %v1722_v1  ;;  %141 = vperm.xlu1 %1655, %v123_v2   ;;  %v125_v8 = vld [vmem:[%s2163_s1] sm:$0xff]  ;;  %v1667_v9 = vld [vmem:[%s2166_s4 + $0x8] sm:$0xff]   ;;  %v128_v10 = vld [vmem:[%s2163_s1 + $0x18] sm:$0xff]  ;;  %v1831_v48 = vshrl.u32 %v169_v45, 7  ;;  %vm1399_vm2 = vcmask 1043459   ;;  %vm1401_vm3 = vcmask 1045509  }
  0x16   :  { %196 = vperm.xlu0 %1656, %v121_v3   ;;  %1615 = vmatprep.subr.bf16.mxu0 %v1666_v7  ;;  %v1668_v11 = vld [vmem:[%s2166_s4 + $0x10] sm:$0xff]   ;;  %v126_v12 = vld [vmem:[%s2163_s1 + $0x8] sm:$0xff]  ;;  %v1669_v13 = vld [vmem:[%s2166_s4 + $0x18] sm:$0xff]   ;;  %vm1403_vm4 = vcmask 1047559  }
  0x17   :  { %1616 = vmatpush3.bf16.msra.mxu0 %v1666_v7  ;;  %v127_v14 = vld [vmem:[%s2163_s1 + $0x10] sm:$0xff]  ;;  %v56_v15 = vld [vmem:[#allocation2] sm:$0xff]  ;;  %v1823_v17 = vld [vmem:[#allocation2 + $0x8] sm:$0xff]  ;;  %v171_v49 = vsub.s32 0, %v1831_v48  ;;  %v229_v50 = vsub.s32 1, %v1831_v48  ;;  %v281_v54 = vsub.s32 2, %v1831_v48 }
  0x18   :  { %1617 = vmatprep.subr.bf16.mxu0 %v1667_v9  ;;  %v60_v16 = vld [vmem:[#allocation2 + $0x20] sm:$0xff]  ;;  %v1825_v19 = vld [vmem:[#allocation2 + $0x28] sm:$0xff] }
  0x19   :  { %146 = vperm.xlu1 %1655, %v124_v4   ;;  %v1544_v18 = vcombine.high %v56_v15, %v60_v16  ;;  %v1543_v20 = vcombine.low %v56_v15, %v60_v16  ;;  %v64_v21 = vld [vmem:[#allocation2 + $0x40] sm:$0xff]  ;;  %v1545_v23 = vcombine.low %v1823_v17, %v1825_v19  ;;  %v1546_v24 = vcombine.high %v1823_v17, %v1825_v19 }
  0x1a   :  { %208 = vperm.xlu0 %1656, %v124_v4   ;;  %v68_v22 = vld [vmem:[#allocation2 + $0x60] sm:$0xff] }
  0x1b   :  { %1618 = vmatpush3.bf16.msra.mxu0 %v1667_v9  ;;  %v1552_v25 = vcombine.high %v64_v21, %v68_v22  ;;  %v72_v26 = vld [vmem:[#allocation2 + $0x80] sm:$0xff]  ;;  %792 = vmatprep.subr.bf16.mxu1 %v1544_v18  ;;  %v1551_v28 = vcombine.low %v64_v21, %v68_v22 }
  0x1c   :  { %1619 = vmatprep.subr.bf16.mxu0 %v1668_v11  ;;  %v76_v27 = vld [vmem:[#allocation2 + $0xa0] sm:$0xff]  ;;  %793 = vmatpush1.bf16.msra.mxu1 %v1543_v20 }
  0x1d   :  { %1657 = vset.pattern.permute.xlu1 %v1721_v0  ;;  %794 = vmatprep.subr.bf16.mxu1 %v1552_v25  ;;  %v1560_v29 = vcombine.high %v72_v26, %v76_v27  ;;  %v80_v30 = vld [vmem:[#allocation2 + $0xc0] sm:$0xff]  ;;  %v1559_v32 = vcombine.low %v72_v26, %v76_v27 }
  0x1e   :  { %1659 = vset.pattern.permute.xlu0 %v1723_v6  ;;  %200 = vperm.xlu1 %1657, %v122_v5   ;;  %v84_v31 = vld [vmem:[#allocation2 + $0xe0] sm:$0xff] }
  0x1f   :  { %252 = vperm.xlu0 %1659, %v122_v5   ;;  %1620 = vmatpush3.bf16.msra.mxu0 %v1668_v11  ;;  %v1568_v33 = vcombine.high %v80_v30, %v84_v31  ;;  %v88_v34 = vld [vmem:[#allocation2 + $0x100] sm:$0xff]  ;;  %v1567_v36 = vcombine.low %v80_v30, %v84_v31 }
  0x20   :  { %1621 = vmatprep.subr.bf16.mxu0 %v1669_v13  ;;  %795 = vmatpush1.bf16.msra.mxu1 %v1551_v28  ;;  %v92_v35 = vld [vmem:[#allocation2 + $0x120] sm:$0xff] }
  0x21   :  { %796 = vmatprep.subr.bf16.mxu1 %v1560_v29  ;;  %v1576_v37 = vcombine.high %v88_v34, %v92_v35  ;;  %v96_v38 = vld [vmem:[#allocation2 + $0x140] sm:$0xff]  ;;  %v1575_v40 = vcombine.low %v88_v34, %v92_v35  ;;  %v69_v34 = vld [vmem:[#allocation2 + $0x68] sm:$0xff] }
  0x22   :  { %204 = vperm.xlu1 %1657, %v123_v2   ;;  %v100_v39 = vld [vmem:[#allocation2 + $0x160] sm:$0xff] }
  0x23   :  { %1660 = vset.pattern.permute.xlu0 %v1722_v1  ;;  %1622 = vmatpush3.bf16.msra.mxu0 %v1669_v13  ;;  %v1584_v41 = vcombine.high %v96_v38, %v100_v39  ;;  %v1583_v42 = vcombine.low %v96_v38, %v100_v39  ;;  %v45_v53 = vld [vmem:[%s2164_s2] sm:$0x7] }
  0x24   :  { %131 = vperm.xlu0 %1660, %v121_v3   ;;  %865 = vmatprep.subr.bf16.mxu0 %v1546_v24  ;;  %v1841_v55 = vrot.slane %v45_v53, %v171_v49  ;;  %v1845_v56 = vrot.slane %v45_v53, %v229_v50  ;;  %v1850_v60 = vrot.slane %v45_v53, %v281_v54  ;;  %v1856_v62 = vld [vmem:[%s2165_s3] ss:$0 sm:$0xff] }
  0x25   :  { %797 = vmatpush1.bf16.msra.mxu1 %v1559_v32 }
  0x26   :  { %1658 = vset.pattern.permute.xlu1 %v1723_v6  ;;  %798 = vmatprep.subr.bf16.mxu1 %v1568_v33  ;;  %v65_v33 = vld [vmem:[#allocation2 + $0x48] sm:$0xff] }
  0x27   :  { %248 = vperm.xlu1 %1658, %v121_v3   ;;  %v1554_v39 = vcombine.high %v65_v33, %v69_v34 }
  0x28   :  { %136 = vperm.xlu0 %1660, %v122_v5  }
  0x29   :  { %799 = vmatpush1.bf16.msra.mxu1 %v1567_v36 }
  0x2a   :  { %800 = vmatprep.subr.bf16.mxu1 %v1576_v37 }
  0x2b   :  { %256 = vperm.xlu1 %1658, %v123_v2  }
  0x2c   :  { %151 = vperm.xlu0 %1660, %v125_v8  }
  0x2d   :  { %801 = vmatpush1.bf16.msra.mxu1 %v1575_v40  ;;  %v73_v40 = vld [vmem:[#allocation2 + $0x88] sm:$0xff] }
  0x2e   :  { %802 = vmatprep.subr.bf16.mxu1 %v1584_v41  ;;  %v77_v41 = vld [vmem:[#allocation2 + $0xa8] sm:$0xff] }
  0x2f   :  { %260 = vperm.xlu1 %1658, %v124_v4   ;;  %v1562_v45 = vcombine.high %v73_v40, %v77_v41 }
  0x30   :  { %166 = vperm.xlu0 %1660, %v128_v10  }
  0x31   :  { %803 = vmatpush1.bf16.msra.mxu1 %v1583_v42 }
  0x33   :  { %1661 = vset.pattern.permute.xlu1 %v1722_v1 }
  0x34   :  { %1663 = vset.pattern.permute.xlu0 %v1721_v0  ;;  %156 = vperm.xlu1 %1661, %v126_v12  }
  0x35   :  { %216 = vperm.xlu0 %1663, %v126_v12  }
  0x38   :  { %161 = vperm.xlu1 %1661, %v127_v14  }
  0x39   :  { %1664 = vset.pattern.permute.xlu0 %v1723_v6 }
  0x3a   :  { %264 = vperm.xlu0 %1664, %v125_v8  }
  0x3c   :  { %1662 = vset.pattern.permute.xlu1 %v1721_v0 }
  0x3d   :  { %212 = vperm.xlu1 %1662, %v125_v8  }
  0x3e   :  { %276 = vperm.xlu0 %1664, %v128_v10  }
  0x41   :  { %220 = vperm.xlu1 %1662, %v127_v14  }
  0x45   :  { %224 = vperm.xlu1 %1662, %v128_v10  }
  0x49   :  { %1665 = vset.pattern.permute.xlu1 %v1723_v6 }
  0x4a   :  { %268 = vperm.xlu1 %1665, %v126_v12  }
  0x4e   :  { %272 = vperm.xlu1 %1665, %v127_v14  }
  0x94   :  { %v142_v43 = vpop.permute.xlu1 %141 }
  0x95   :  { %v197_v44 = vpop.permute.xlu0 %196  ;;  %v175_v4 = vmul.f32 %v1841_v55, %v142_v43 }
  0x96   :  { %v231_v59 = vmul.f32 %v1845_v56, %v197_v44  ;;  %v1553_v44 = vcombine.low %v65_v33, %v69_v34 }
  0x97   :  { %v189_v15 = vadd.f32 %v1856_v62, %v175_v4 }
  0x98   :  { %v147_v46 = vpop.permute.xlu1 %146 }
  0x99   :  { %v209_v47 = vpop.permute.xlu0 %208  ;;  %v176_v0 = vmul.f32 %v1841_v55, %v147_v46  ;;  %v81_v46 = vld [vmem:[#allocation2 + $0xc8] sm:$0xff] }
  0x9a   :  { %v234_v13 = vmul.f32 %v1845_v56, %v209_v47  ;;  %v85_v47 = vld [vmem:[#allocation2 + $0xe8] sm:$0xff] }
  0x9b   :  { %v190_v12 = vadd.f32 %v1856_v62, %v176_v0  ;;  %v1570_v53 = vcombine.high %v81_v46, %v85_v47  ;;  %v1569_v0 = vcombine.low %v81_v46, %v85_v47  ;;  %v116_v47 = vld [vmem:[#allocation2 + $0x1e0] sm:$0xff] }
  0x9d   :  { %v201_v51 = vpop.permute.xlu1 %200  ;;  %v242_v24 = vadd.f32 %v234_v13, %v190_v12 }
  0x9e   :  { %v253_v52 = vpop.permute.xlu0 %252  ;;  %v232_v8 = vmul.f32 %v1845_v56, %v201_v51 }
  0x9f   :  { %v284_v9 = vmul.f32 %v1850_v60, %v253_v52  ;;  %v1561_v52 = vcombine.low %v73_v40, %v77_v41  ;;  %v108_v40 = vld [vmem:[#allocation2 + $0x1a0] sm:$0xff]  ;;  %v105_v41 = vld [vmem:[#allocation2 + $0x188] sm:$0xff] }
  0xa1   :  { %v205_v57 = vpop.permute.xlu1 %204 }
  0xa2   :  { %v233_v10 = vmul.f32 %v1845_v56, %v205_v57 }
  0xa3   :  { %v132_v58 = vpop.permute.xlu0 %131 }
  0xa4   :  { %v173_v61 = vmul.f32 %v1841_v55, %v132_v58  ;;  %v241_v21 = vadd.f32 %v233_v10, %v189_v15  ;;  %v89_v58 = vld [vmem:[#allocation2 + $0x108] sm:$0xff] }
  0xa6   :  { %v187_v63 = vadd.f32 %v1856_v62, %v173_v61  ;;  %v249_v2 = vpop.permute.xlu1 %248 }
  0xa7   :  { %v137_v3 = vpop.permute.xlu0 %136  ;;  %v283_v6 = vmul.f32 %v1850_v60, %v249_v2  ;;  %v97_v2 = vld [vmem:[#allocation2 + $0x148] sm:$0xff] }
  0xa8   :  { %v239_v5 = vadd.f32 %v231_v59, %v187_v63  ;;  %v174_v7 = vmul.f32 %v1841_v55, %v137_v3  ;;  %v93_v59 = vld [vmem:[#allocation2 + $0x128] sm:$0xff] }
  0xa9   :  { %v101_v3 = vld [vmem:[#allocation2 + $0x168] sm:$0xff] }
  0xaa   :  { %v188_v11 = vadd.f32 %v1856_v62, %v174_v7  ;;  %v257_v14 = vpop.permute.xlu1 %256  ;;  %v291_v16 = vadd.f32 %v283_v6, %v239_v5 }
  0xab   :  { %v285_v20 = vmul.f32 %v1850_v60, %v257_v14  ;;  %v152_v32 = vpop.permute.xlu0 %151 }
  0xac   :  { %v240_v18 = vadd.f32 %v232_v8, %v188_v11  ;;  %v299_v26 = vmax.f32 %v291_v16, 0.0  ;;  %v177_v61 = vmul.f32 %v1841_v55, %v152_v32  ;;  %v1577_v8 = vcombine.low %v89_v58, %v93_v59 }
  0xad   :  { %v293_v27 = vadd.f32 %v285_v20, %v241_v21  ;;  %v1585_v20 = vcombine.low %v97_v2, %v101_v3 }
  0xae   :  { %v292_v22 = vadd.f32 %v284_v9, %v240_v18  ;;  %v261_v25 = vpop.permute.xlu1 %260  ;;  %v191_v5 = vadd.f32 %v1856_v62, %v177_v61  ;;  %v1586_v9 = vcombine.high %v97_v2, %v101_v3  ;;  %v58_v61 = vld [vmem:[#allocation2 + $0x10] sm:$0xff] }
  0xaf   :  { %v286_v28 = vmul.f32 %v1850_v60, %v261_v25  ;;  %v301_v35 = vmax.f32 %v293_v27, 0.0  ;;  %v167_v43 = vpop.permute.xlu0 %166 }
  0xb0   :  { %v300_v29 = vmax.f32 %v292_v22, 0.0  ;;  %v180_v6 = vmul.f32 %v1841_v55, %v167_v43  ;;  %v109_v43 = vld [vmem:[#allocation2 + $0x1a8] sm:$0xff] }
  0xb1   :  { %v294_v30 = vadd.f32 %v286_v28, %v242_v24 }
  0xb2   :  { %v307_v31 = vpack.c.bf16 %v300_v29, %v299_v26  ;;  %v194_v16 = vadd.f32 %v1856_v62, %v180_v6 }
  0xb3   :  { %v302_v36 = vmax.f32 %v294_v30, 0.0  ;;  %v157_v37 = vpop.permute.xlu1 %156 }
  0xb4   :  { %1623 = vmatprep.mubr.msk.bf16.mxu0 %vm341_vm0, %v307_v31  ;;  %v217_v57 = vpop.permute.xlu0 %216  ;;  %v178_v17 = vmul.f32 %v1841_v55, %v157_v37 }
  0xb5   :  { %v308_v38 = vpack.c.bf16 %v302_v36, %v301_v35  ;;  %v236_v11 = vmul.f32 %v1845_v56, %v217_v57 }
  0xb6   :  { %v192_v10 = vadd.f32 %v1856_v62, %v178_v17 }
  0xb7   :  { %v162_v42 = vpop.permute.xlu1 %161  ;;  %1624 = vmatmul.mubr.msk.bf16.vlgmr.msra.gmra.mrb[0].mxu0 %vm341_vm0, %v308_v38 }
  0xb8   :  { %866 = vmatpush1.bf16.msra.mxu0 %v1545_v23  ;;  %v1578_v23 = vcombine.high %v89_v58, %v93_v59  ;;  %v179_v18 = vmul.f32 %v1841_v55, %v162_v42  ;;  %v244_v21 = vadd.f32 %v236_v11, %v192_v10 }
  0xb9   :  { %867 = vmatprep.subr.bf16.mxu0 %v1554_v39  ;;  %v265_v4 = vpop.permute.xlu0 %264 }
  0xba   :  { %v287_v13 = vmul.f32 %v1850_v60, %v265_v4  ;;  %v193_v29 = vadd.f32 %v1856_v62, %v179_v18  ;;  %v104_v62 = vld [vmem:[#allocation2 + $0x180] sm:$0xff] }
  0xbb   :  { %v1592_v42 = vcombine.high %v104_v62, %v108_v40  ;;  %v1591_v46 = vcombine.low %v104_v62, %v108_v40  ;;  %v1904_v4 = vld [vmem:[%s2167_s5] ss:$0 sm:$0xff] }
  0xbc   :  { %v213_v51 = vpop.permute.xlu1 %212  ;;  %868 = vmatpush1.bf16.msra.mxu0 %v1553_v44  ;;  %v1593_v44 = vcombine.low %v105_v41, %v109_v43 }
  0xbd   :  { %869 = vmatprep.subr.bf16.mxu0 %v1562_v45  ;;  %v235_v19 = vmul.f32 %v1845_v56, %v213_v51  ;;  %v277_v15 = vpop.permute.xlu0 %276  ;;  %v1594_v45 = vcombine.high %v105_v41, %v109_v43  ;;  %804 = vmatprep.subr.bf16.mxu1 %v1592_v42  ;;  %v113_v51 = vld [vmem:[#allocation2 + $0x1c8] sm:$0xff]  ;;  %v90_v41 = vld [vmem:[#allocation2 + $0x110] sm:$0xff]  ;;  %v91_v43 = vld [vmem:[#allocation2 + $0x118] sm:$0xff] }
  0xbe   :  { %v290_v27 = vmul.f32 %v1850_v60, %v277_v15  ;;  %805 = vmatpush1.bf16.msra.mxu1 %v1591_v46  ;;  %v66_v15 = vld [vmem:[#allocation2 + $0x50] sm:$0xff] }
  0xbf   :  { %v243_v12 = vadd.f32 %v235_v19, %v191_v5  ;;  %v94_v42 = vld [vmem:[#allocation2 + $0x130] sm:$0xff] }
  0xc0   :  { %v221_v63 = vpop.permute.xlu1 %220  ;;  %870 = vmatpush1.bf16.msra.mxu0 %v1561_v52 }
  0xc1   :  { %871 = vmatprep.subr.bf16.mxu0 %v1570_v53  ;;  %v295_v22 = vadd.f32 %v287_v13, %v243_v12  ;;  %v237_v25 = vmul.f32 %v1845_v56, %v221_v63  ;;  %v117_v53 = vld [vmem:[#allocation2 + $0x1e8] sm:$0xff]  ;;  %v62_v63 = vld [vmem:[#allocation2 + $0x30] sm:$0xff] }
  0xc2   :  { %v1601_v57 = vcombine.low %v113_v51, %v117_v53  ;;  %v1602_v58 = vcombine.high %v113_v51, %v117_v53  ;;  %v1547_v17 = vcombine.low %v58_v61, %v62_v63  ;;  %v1548_v19 = vcombine.high %v58_v61, %v62_v63  ;;  %v98_v51 = vld [vmem:[#allocation2 + $0x150] sm:$0xff]  ;;  %v99_v53 = vld [vmem:[#allocation2 + $0x158] sm:$0xff] }
  0xc3   :  { %v303_v31 = vmax.f32 %v295_v22, 0.0  ;;  %v245_v55 = vadd.f32 %v237_v25, %v193_v29  ;;  %v71_v22 = vld [vmem:[#allocation2 + $0x78] sm:$0xff]  ;;  %v78_v29 = vld [vmem:[#allocation2 + $0xb0] sm:$0xff] }
  0xc4   :  { %v225_v7 = vpop.permute.xlu1 %224  ;;  %872 = vmatpush1.bf16.msra.mxu0 %v1569_v0  ;;  %v59_v0 = vld [vmem:[#allocation2 + $0x18] sm:$0xff] }
  0xc5   :  { %873 = vmatprep.subr.bf16.mxu0 %v1578_v23  ;;  %v238_v14 = vmul.f32 %v1845_v56, %v225_v7  ;;  %v63_v23 = vld [vmem:[#allocation2 + $0x38] sm:$0xff] }
  0xc6   :  { %v1896_v2 = vcombine.low %v59_v0, %v63_v23  ;;  %v1898_v3 = vcombine.high %v59_v0, %v63_v23  ;;  %v106_v0 = vld [vmem:[#allocation2 + $0x190] sm:$0xff]  ;;  %v111_v23 = vld [vmem:[#allocation2 + $0x1b8] sm:$0xff] }
  0xc7   :  { %v246_v26 = vadd.f32 %v238_v14, %v194_v16 }
  0xc8   :  { %874 = vmatpush1.bf16.msra.mxu0 %v1577_v8 }
  0xc9   :  { %v269_v24 = vpop.permute.xlu1 %268  ;;  %875 = vmatprep.subr.bf16.mxu0 %v1586_v9  ;;  %v298_v33 = vadd.f32 %v290_v27, %v246_v26 }
  0xca   :  { %v288_v28 = vmul.f32 %v1850_v60, %v269_v24 }
  0xcb   :  { %v306_v38 = vmax.f32 %v298_v33, 0.0 }
  0xcc   :  { %v296_v30 = vadd.f32 %v288_v28, %v244_v21  ;;  %876 = vmatpush1.bf16.msra.mxu0 %v1585_v20  ;;  %v70_v20 = vld [vmem:[#allocation2 + $0x70] sm:$0xff]  ;;  %v67_v21 = vld [vmem:[#allocation2 + $0x58] sm:$0xff] }
  0xcd   :  { %v273_v32 = vpop.permute.xlu1 %272  ;;  %877 = vmatprep.subr.bf16.mxu0 %v1594_v45  ;;  %v1556_v26 = vcombine.high %v66_v15, %v70_v20  ;;  %v1914_v27 = vcombine.high %v67_v21, %v71_v22  ;;  %v74_v28 = vld [vmem:[#allocation2 + $0x90] sm:$0xff] }
  0xce   :  { %v304_v34 = vmax.f32 %v296_v30, 0.0  ;;  %v289_v35 = vmul.f32 %v1850_v60, %v273_v32  ;;  %v112_v60 = vld [vmem:[#allocation2 + $0x1c0] sm:$0xff]  ;;  %v75_v30 = vld [vmem:[#allocation2 + $0x98] sm:$0xff]  ;;  %v1555_v32 = vcombine.low %v66_v15, %v70_v20  ;;  %v1564_v33 = vcombine.high %v74_v28, %v78_v29 }
  0xcf   :  { %v1600_v52 = vcombine.high %v112_v60, %v116_v47  ;;  %v1599_v59 = vcombine.low %v112_v60, %v116_v47  ;;  %v1580_v60 = vcombine.high %v90_v41, %v94_v42 }
  0xd0   :  { %v309_v36 = vpack.c.bf16 %v304_v34, %v303_v31  ;;  %v297_v37 = vadd.f32 %v289_v35, %v245_v55  ;;  %878 = vmatpush1.bf16.msra.mxu0 %v1593_v44  ;;  %v79_v31 = vld [vmem:[#allocation2 + $0xb8] sm:$0xff]  ;;  %v1921_v55 = vcombine.low %v67_v21, %v71_v22  ;;  %v82_v35 = vld [vmem:[#allocation2 + $0xd0] sm:$0xff] }
  0xd1   :  { %806 = vmatprep.subr.bf16.mxu1 %v1600_v52  ;;  %879 = vmatprep.subr.bf16.mxu0 %v1602_v58  ;;  %v1924_v34 = vcombine.high %v75_v30, %v79_v31  ;;  %v95_v44 = vld [vmem:[#allocation2 + $0x138] sm:$0xff]  ;;  %v102_v52 = vld [vmem:[#allocation2 + $0x170] sm:$0xff]  ;;  %v1579_v58 = vcombine.low %v90_v41, %v94_v42 }
  0xd2   :  { %v305_v56 = vmax.f32 %v297_v37, 0.0  ;;  %1627 = vmatprep.mubr.msk.bf16.mxu0 %vm341_vm0, %v309_v36  ;;  %807 = vmatpush1.bf16.msra.mxu1 %v1599_v59  ;;  %v86_v36 = vld [vmem:[#allocation2 + $0xf0] sm:$0xff]  ;;  %v83_v37 = vld [vmem:[#allocation2 + $0xd8] sm:$0xff]  ;;  %v1940_v47 = vcombine.high %v91_v43, %v95_v44  ;;  %v1943_v59 = vcombine.low %v91_v43, %v95_v44  ;;  %v1588_v61 = vcombine.high %v98_v51, %v102_v52 }
  0xd3   :  { %938 = vmatprep.subr.bf16.mxu1 %v1548_v19  ;;  %v1572_v62 = vcombine.high %v82_v35, %v86_v36  ;;  %v1571_v45 = vcombine.low %v82_v35, %v86_v36  ;;  %v107_v19 = vld [vmem:[#allocation2 + $0x198] sm:$0xff] }
  0xd4   :  { %v310_v39 = vpack.c.bf16 %v306_v38, %v305_v56  ;;  %880 = vmatpush1.bf16.msra.mxu0 %v1601_v57  ;;  %v87_v38 = vld [vmem:[#allocation2 + $0xf8] sm:$0xff]  ;;  %v1563_v56 = vcombine.low %v74_v28, %v78_v29 }
  0xd5   :  { %1011 = vmatprep.subr.bf16.mxu0 %v1898_v3  ;;  %v1930_v40 = vcombine.high %v83_v37, %v87_v38  ;;  %v1937_v46 = vcombine.low %v83_v37, %v87_v38  ;;  %v103_v57 = vld [vmem:[#allocation2 + $0x178] sm:$0xff] }
  0xd6   :  { %1628 = vmatmul.mubr.msk.bf16.gmra.mrb[4].mxu0 %vm341_vm0, %v310_v39  ;;  %v1927_v39 = vcombine.low %v75_v30, %v79_v31  ;;  %v1946_v63 = vcombine.high %v99_v53, %v103_v57 }
  0xd7   :  { %897 = vmatprep.mubr.bf16.mxu0 %v1722_v1 }
 0x18a   :  { %v1625_v5 = vpop.f32.mrb[0].mxu0 }
 0x18b   :  { %v397_v6 = vadd.f32 %v1625_v5, %v1904_v4  ;;  %v388_v7 = vpop.f32.mrb[1].mxu0  ;;  %v1587_v5 = vcombine.low %v98_v51, %v102_v52 }
 0x18c   :  { %v389_v8 = vadd.f32 %v1904_v4, %v388_v7  ;;  %v1626_v9 = vpop.f32.mrb[2].mxu0 }
 0x18d   :  { %v400_v10 = vadd.f32 %v1626_v9, %v1904_v4  ;;  %v391_v11 = vpop.f32.mrb[3].mxu0  ;;  %v421_v13 = vmax.f32 %v397_v6, 0.0  ;;  %v1949_v6 = vcombine.low %v99_v53, %v103_v57  ;;  %v114_v9 = vld [vmem:[#allocation2 + $0x1d0] sm:$0xff] }
 0x18e   :  { %v392_v12 = vadd.f32 %v1904_v4, %v391_v11  ;;  %v419_v16 = vmax.f32 %v389_v8, 0.0  ;;  %v1952_v8 = vcombine.high %v107_v19, %v111_v23  ;;  %v115_v11 = vld [vmem:[#allocation2 + $0x1d8] sm:$0xff] }
 0x18f   :  { %v422_v14 = vmax.f32 %v400_v10, 0.0  ;;  %v118_v10 = vld [vmem:[#allocation2 + $0x1f0] sm:$0xff] }
 0x190   :  { %v420_v18 = vmax.f32 %v392_v12, 0.0  ;;  %v119_v12 = vld [vmem:[#allocation2 + $0x1f8] sm:$0xff]  ;;  %v1604_v22 = vcombine.high %v114_v9, %v118_v10 }
 0x191   :  { %v1910_v24 = vpack.c.bf16 %v422_v14, %v421_v13  ;;  %v1605_v35 = vcombine.low %v115_v11, %v119_v12 }
 0x192   :  { %v1912_v25 = vpack.c.bf16 %v420_v18, %v419_v16  ;;  %v1597_v18 = vcombine.low %v107_v19, %v111_v23 }
 0x194   :  { %825 = vmatmul.mubr.bf16.vlgmr.msra.gmra.mrb[0].mxu1 %v1912_v25  ;;  %898 = vmatmul.mubr.bf16.vlgmr.msra.gmra.mrb[8].mxu0 %v1912_v25 }
 0x195   :  { %834 = vmatprep.mubr.bf16.mxu1 %v1722_v1  ;;  %907 = vmatprep.mubr.bf16.mxu0 %v1722_v1 }
 0x196   :  { %939 = vmatpush1.bf16.msra.mxu1 %v1547_v17  ;;  %1012 = vmatpush1.bf16.msra.mxu0 %v1896_v2  ;;  %v110_v17 = vld [vmem:[#allocation2 + $0x1b0] sm:$0xff] }
 0x197   :  { %940 = vmatprep.subr.bf16.mxu1 %v1556_v26  ;;  %1013 = vmatprep.subr.bf16.mxu0 %v1914_v27  ;;  %v1596_v7 = vcombine.high %v106_v0, %v110_v17  ;;  %v1595_v16 = vcombine.low %v106_v0, %v110_v17  ;;  %v1606_v26 = vcombine.high %v115_v11, %v119_v12 }
 0x19a   :  { %941 = vmatpush1.bf16.msra.mxu1 %v1555_v32  ;;  %1014 = vmatpush1.bf16.msra.mxu0 %v1921_v55 }
 0x19b   :  { %942 = vmatprep.subr.bf16.mxu1 %v1564_v33  ;;  %1015 = vmatprep.subr.bf16.mxu0 %v1924_v34  ;;  %v1603_v33 = vcombine.low %v114_v9, %v118_v10 }
 0x19c   :  { %835 = vmatmul.mubr.bf16.gmra.mrb[4].mxu1 %v1910_v24  ;;  %908 = vmatmul.mubr.bf16.gmra.mrb[12].mxu0 %v1910_v24 }
 0x19d   :  { %844 = vmatprep.mubr.bf16.mxu1 %v1722_v1  ;;  %917 = vmatprep.mubr.bf16.mxu0 %v1722_v1 }
 0x19e   :  { %943 = vmatpush1.bf16.msra.mxu1 %v1563_v56  ;;  %1016 = vmatpush1.bf16.msra.mxu0 %v1927_v39 }
 0x19f   :  { %944 = vmatprep.subr.bf16.mxu1 %v1572_v62  ;;  %1017 = vmatprep.subr.bf16.mxu0 %v1930_v40 }
 0x1a2   :  { %945 = vmatpush1.bf16.msra.mxu1 %v1571_v45  ;;  %1018 = vmatpush1.bf16.msra.mxu0 %v1937_v46 }
 0x1a3   :  { %946 = vmatprep.subr.bf16.mxu1 %v1580_v60  ;;  %1019 = vmatprep.subr.bf16.mxu0 %v1940_v47 }
 0x1a6   :  { %947 = vmatpush1.bf16.msra.mxu1 %v1579_v58  ;;  %1020 = vmatpush1.bf16.msra.mxu0 %v1943_v59 }
 0x1a7   :  { %948 = vmatprep.subr.bf16.mxu1 %v1588_v61  ;;  %1021 = vmatprep.subr.bf16.mxu0 %v1946_v63 }
 0x1a9   :  { %v1629_v13 = vpop.f32.mrb[4].mxu0 }
 0x1aa   :  { %v413_v14 = vadd.f32 %v1629_v13, %v1904_v4  ;;  %v404_v15 = vpop.f32.mrb[5].mxu0  ;;  %949 = vmatpush1.bf16.msra.mxu1 %v1587_v5  ;;  %1022 = vmatpush1.bf16.msra.mxu0 %v1949_v6 }
 0x1ab   :  { %v405_v20 = vadd.f32 %v1904_v4, %v404_v15  ;;  %v1630_v21 = vpop.f32.mrb[6].mxu0  ;;  %950 = vmatprep.subr.bf16.mxu1 %v1596_v7  ;;  %1023 = vmatprep.subr.bf16.mxu0 %v1952_v8 }
 0x1ac   :  { %v416_v28 = vadd.f32 %v1630_v21, %v1904_v4  ;;  %v407_v29 = vpop.f32.mrb[7].mxu0  ;;  %v425_v31 = vmax.f32 %v413_v14, 0.0 }
 0x1ad   :  { %v408_v30 = vadd.f32 %v1904_v4, %v407_v29  ;;  %v423_v36 = vmax.f32 %v405_v20, 0.0  ;;  %v1724_v4 = vmov 1983009808  }
 0x1ae   :  { %v426_v32 = vmax.f32 %v416_v28, 0.0  ;;  %951 = vmatpush1.bf16.msra.mxu1 %v1595_v16  ;;  %1024 = vmatpush1.bf16.msra.mxu0 %v1597_v18 }
 0x1af   :  { %v424_v37 = vmax.f32 %v408_v30, 0.0  ;;  %952 = vmatprep.subr.bf16.mxu1 %v1604_v22  ;;  %1025 = vmatprep.subr.bf16.mxu0 %v1606_v26 }
 0x1b0   :  { %v430_v38 = vpack.c.bf16 %v426_v32, %v425_v31 }
 0x1b1   :  { %v429_v56 = vpack.c.bf16 %v424_v37, %v423_v36 }
 0x1b2   :  { %953 = vmatpush1.bf16.msra.mxu1 %v1603_v33  ;;  %1026 = vmatpush1.bf16.msra.mxu0 %v1605_v35 }
 0x1b3   :  { %845 = vmatmul.mubr.bf16.gmra.mrb[8].mxu1 %v429_v56  ;;  %918 = vmatmul.mubr.bf16.gmra.mrb[16].mxu0 %v429_v56 }
 0x1b4   :  { %854 = vmatprep.mubr.bf16.mxu1 %v1722_v1  ;;  %927 = vmatprep.mubr.bf16.mxu0 %v1722_v1 }
 0x1b5   :  { %1631 = vmatprep.subr.bf16.mxu1 %v1898_v3  ;;  %v446_v3 = vsub.s32 3, %v1831_v48 }
 0x1bb   :  { %855 = vmatmul.mubr.bf16.gmra.mrb[12].mxu1 %v430_v38  ;;  %928 = vmatmul.mubr.bf16.gmra.mrb[20].mxu0 %v430_v38 }
 0x1bc   :  { %970 = vmatprep.mubr.bf16.mxu1 %v1722_v1  ;;  %1043 = vmatprep.mubr.bf16.mxu0 %v1722_v1 }
 0x1c3   :  { %971 = vmatmul.mubr.bf16.vlgmr.msra.gmra.mrb[16].mxu1 %v1912_v25  ;;  %1044 = vmatmul.mubr.bf16.vlgmr.msra.gmra.mrb[24].mxu0 %v1912_v25 }
 0x1c4   :  { %1639 = vmatpush1.bf16.msra.mxu1 %v1896_v2  ;;  %980 = vmatprep.mubr.bf16.mxu1 %v1722_v1  ;;  %v1990_v2 = vld [vmem:[%s2169_s7] sm:$0xff]  ;;  %s1725_s7 = smov [#allocation5]  }
 0x1c5   :  { %1632 = vmatprep.subr.bf16.mxu1 %v1914_v27  ;;  %1053 = vmatprep.mubr.bf16.mxu0 %v1722_v1  ;;  %v1996_v25 = vrot.slane %v1990_v2, %v171_v49  ;;  %s1524_s22 = sshll.u32 %s1725_s7, 4  ;;  %s1525_s22 = int_to_ptr.vmem [resolvable:$true] %s1524_s22 }
 0x1c6   :  { %s1692_s6 = scalar_lea.vmem %s1525_s22, 512  ;;  %p1697_p9 = scmp.lt.s32.totalorder %s1525_s22, %s1525_s22 }
 0x1c7   :  { %p1693_p8 = scmp.ne.s32.totalorder %s1525_s22, %s1692_s6  ;;  %p1698_p10 = scmp.lt.s32.totalorder %s1692_s6, %s1692_s6 }
 0x1c8   :  { %1640 = vmatpush1.bf16.msra.mxu1 %v1921_v55 }
 0x1c9   :  { %1633 = vmatprep.subr.bf16.mxu1 %v1924_v34  ;;  %v2006_v34 = vrot.slane %v1990_v2, %v229_v50  ;;  %p1699_p11 = por %p1698_p10, %p1697_p9 }
 0x1cb   :  { %981 = vmatmul.mubr.bf16.gmra.mrb[20].mxu1 %v1910_v24  ;;  %1054 = vmatmul.mubr.bf16.gmra.mrb[28].mxu0 %v1910_v24  ;;  %v1327_v24 = vunpack.c.l.s4 %v1724_v4  ;;  %p1700_p12 = pnand %p1699_p11, %p1693_p8 }
 0x1cc   :  { %1641 = vmatpush1.bf16.msra.mxu1 %v1927_v39  ;;  %990 = vmatprep.mubr.bf16.mxu1 %v1722_v1  ;;  %v2009_v39 = vrot.slane %v1990_v2, %v446_v3 }
 0x1cd   :  { %1634 = vmatprep.subr.bf16.mxu1 %v1930_v40  ;;  %1063 = vmatprep.mubr.bf16.mxu0 %v1722_v1  ;;  %v1328_v42 = vunpack.c.0.s8 %v1327_v24 }
 0x1cf   :  { %v2020_v17 = vsub.s32 %v1328_v42, %v1831_v48 }
 0x1d0   :  { %1642 = vmatpush1.bf16.msra.mxu1 %v1937_v46 }
 0x1d1   :  { %1635 = vmatprep.subr.bf16.mxu1 %v1940_v47 }
 0x1d3   :  { %991 = vmatmul.mubr.bf16.gmra.mrb[24].mxu1 %v429_v56  ;;  %1064 = vmatmul.mubr.bf16.gmra.mrb[32].mxu0 %v429_v56 }
 0x1d4   :  { %1643 = vmatpush1.bf16.msra.mxu1 %v1943_v59  ;;  %1000 = vmatprep.mubr.bf16.mxu1 %v1722_v1 }
 0x1d5   :  { %1636 = vmatprep.subr.bf16.mxu1 %v1946_v63 }
 0x1d8   :  { %1644 = vmatpush1.bf16.msra.mxu1 %v1949_v6 }
 0x1d9   :  { %1637 = vmatprep.subr.bf16.mxu1 %v1952_v8 }
 0x1db   :  { %1001 = vmatmul.mubr.bf16.gmra.mrb[28].mxu1 %v430_v38 }
 0x1dc   :  { %1645 = vmatpush1.bf16.msra.mxu1 %v1597_v18  ;;  %1073 = vmatprep.mubr.bf16.mxu1 %v1722_v1  ;;  %v2001_v1 = vrot.slane %v1990_v2, %v281_v54 }
 0x1dd   :  { %1638 = vmatprep.subr.bf16.mxu1 %v1606_v26 }
 0x1e0   :  { %1646 = vmatpush1.bf16.msra.mxu1 %v1605_v35 }
 0x1e3   :  { %1074 = vmatmul.mubr.bf16.vlgmr.msra.gmra.mrb[32].mxu1 %v430_v38 }
 0x267   :  { %v826_v27 = vpop.f32.mrb[0].mxu1  ;;  %v899_v55 = vpop.f32.mrb[8].mxu0 }
 0x268   :  { %v828_v62 = vpop.f32.mrb[1].mxu1  ;;  %v901_v40 = vpop.f32.mrb[9].mxu0  ;;  %v827_v43 = vadd.f32 %v826_v27, %v1996_v25  ;;  %v900_v54 = vadd.f32 %v899_v55, %v2001_v1 }
 0x269   :  { %v830_v41 = vpop.f32.mrb[2].mxu1  ;;  %v903_v49 = vpop.f32.mrb[10].mxu0  ;;  %v829_v50 = vadd.f32 %v828_v62, %v2006_v34  ;;  %v902_v47 = vadd.f32 %v901_v40, %v2009_v39 }
 0x26a   :  { %v831_v44 = vadd.f32 %v830_v41, %v1996_v25  ;;  %v904_v45 = vadd.f32 %v903_v49, %v2001_v1  ;;  %v832_v46 = vpop.f32.mrb[3].mxu1  ;;  %v905_v60 = vpop.f32.mrb[11].mxu0 }
 0x26b   :  { %v833_v51 = vadd.f32 %v832_v46, %v2006_v34  ;;  %v906_v52 = vadd.f32 %v905_v60, %v2009_v39 }
 0x26c   :  { %v1084_v53 = vmax.f32 %v827_v43, %v831_v44  ;;  %v1098_v57 = vmax.f32 %v900_v54, %v904_v45 }
 0x26d   :  { %v1091_v58 = vmax.f32 %v829_v50, %v833_v51  ;;  %v1105_v59 = vmax.f32 %v902_v47, %v906_v52 }
 0x26e   :  { %v1085_v61 = vrot.slane %v1084_v53, 4  ;;  %v1099_v63 = vrot.slane %v1098_v57, 4 }
 0x26f   :  { %v1092_v0 = vrot.slane %v1091_v58, 4  ;;  %v1106_v19 = vrot.slane %v1105_v59, 4  ;;  %v836_v23 = vpop.f32.mrb[4].mxu1  ;;  %v909_v5 = vpop.f32.mrb[12].mxu0 }
 0x270   :  { %v1086_v6 = vmax.f32 %v1084_v53, %v1085_v61  ;;  %v1100_v7 = vmax.f32 %v1098_v57, %v1099_v63  ;;  %v837_v8 = vadd.f32 %v836_v23, %v1996_v25  ;;  %v910_v9 = vadd.f32 %v909_v5, %v2001_v1  ;;  %v838_v10 = vpop.f32.mrb[5].mxu1  ;;  %v911_v11 = vpop.f32.mrb[13].mxu0 }
 0x271   :  { %v1093_v12 = vmax.f32 %v1091_v58, %v1092_v0  ;;  %v1107_v13 = vmax.f32 %v1105_v59, %v1106_v19  ;;  %v839_v14 = vadd.f32 %v838_v10, %v2006_v34  ;;  %v912_v15 = vadd.f32 %v911_v11, %v2009_v39  ;;  %v840_v16 = vpop.f32.mrb[6].mxu1  ;;  %v913_v18 = vpop.f32.mrb[14].mxu0 }
 0x272   :  { %v1087_v20 = vrot.slane %v1086_v6, 2  ;;  %v1101_v21 = vrot.slane %v1100_v7, 2  ;;  %v841_v22 = vadd.f32 %v840_v16, %v1996_v25  ;;  %v914_v26 = vadd.f32 %v913_v18, %v2001_v1  ;;  %v842_v28 = vpop.f32.mrb[7].mxu1  ;;  %v915_v29 = vpop.f32.mrb[15].mxu0 }
 0x273   :  { %v1094_v30 = vrot.slane %v1093_v12, 2  ;;  %v1108_v31 = vrot.slane %v1107_v13, 2  ;;  %v843_v32 = vadd.f32 %v842_v28, %v2006_v34  ;;  %v916_v33 = vadd.f32 %v915_v29, %v2009_v39 }
 0x274   :  { %v1088_v35 = vmax.f32 %v1086_v6, %v1087_v20  ;;  %v1102_v36 = vmax.f32 %v1100_v7, %v1101_v21  ;;  %v1140_v37 = vmax.f32 %v837_v8, %v841_v22  ;;  %v1154_v38 = vmax.f32 %v910_v9, %v914_v26 }
 0x275   :  { %v1095_v56 = vmax.f32 %v1093_v12, %v1094_v30  ;;  %v1109_v3 = vmax.f32 %v1107_v13, %v1108_v31  ;;  %v1147_v4 = vmax.f32 %v839_v14, %v843_v32  ;;  %v1161_v24 = vmax.f32 %v912_v15, %v916_v33 }
 0x276   :  { %v1089_v27 = vrot.slane %v1088_v35, 1  ;;  %v1103_v55 = vrot.slane %v1102_v36, 1  ;;  %v1141_v62 = vrot.slane %v1140_v37, 4  ;;  %v1155_v40 = vrot.slane %v1154_v38, 4 }
 0x277   :  { %v1096_v41 = vrot.slane %v1095_v56, 1  ;;  %v1110_v49 = vrot.slane %v1109_v3, 1  ;;  %v1148_v42 = vrot.slane %v1147_v4, 4  ;;  %v1162_v43 = vrot.slane %v1161_v24, 4 }
 0x278   :  { %v1090_v54 = vmax.f32 %v1088_v35, %v1089_v27  ;;  %v1104_v44 = vmax.f32 %v1102_v36, %v1103_v55  ;;  %v1142_v45 = vmax.f32 %v1140_v37, %v1141_v62  ;;  %v1156_v46 = vmax.f32 %v1154_v38, %v1155_v40 }
 0x279   :  { %v1097_v60 = vmax.f32 %v1095_v56, %v1096_v41  ;;  %v1111_v50 = vmax.f32 %v1109_v3, %v1110_v49  ;;  %v1149_v47 = vmax.f32 %v1147_v4, %v1148_v42  ;;  %v1163_v51 = vmax.f32 %v1161_v24, %v1162_v43 }
 0x27a   :  { %v1143_v52 = vrot.slane %v1142_v45, 2  ;;  %v1157_v53 = vrot.slane %v1156_v46, 2  ;;  %v450_v16 = vsub.s32 4, %v1831_v48  ;;  %v458_v33 = vsub.s32 6, %v1831_v48 }
 0x27b   :  { %v1324_v57 = vcombine.low %v1090_v54, %v1097_v60  ;;  %v1325_v58 = vcombine.low %v1104_v44, %v1111_v50  ;;  %v1150_v59 = vrot.slane %v1149_v47, 2  ;;  %v1164_v61 = vrot.slane %v1163_v51, 2 }
 0x27c   :  { %v1144_v63 = vmax.f32 %v1142_v45, %v1143_v52  ;;  %v1158_v0 = vmax.f32 %v1156_v46, %v1157_v53  ;;  %v2036_v29 = vrot.slane %v1990_v2, %v450_v16  ;;  %v454_v35 = vsub.s32 5, %v1831_v48 }
 0x27d   :  { %v1332_v19 = vrot.slane %v1324_v57, %v2020_v17  ;;  %v1339_v23 = vrot.slane %v1325_v58, %v2020_v17  ;;  %v1151_v5 = vmax.f32 %v1149_v47, %v1150_v59  ;;  %v1165_v6 = vmax.f32 %v1163_v51, %v1164_v61 }
 0x27e   :  { %v1145_v7 = vrot.slane %v1144_v63, 1  ;;  %v1159_v8 = vrot.slane %v1158_v0, 1  ;;  %v462_v56 = vsub.s32 7, %v1831_v48  ;;  %v2051_v46 = vrot.slane %v1990_v2, %v458_v33 }
 0x27f   :  { %v1340_v9 = vcombine.low %v1332_v19, %v1339_v23  ;;  %v1152_v10 = vrot.slane %v1151_v5, 1  ;;  %v1166_v11 = vrot.slane %v1165_v6, 1  ;;  %v2055_v51 = vrot.slane %v1990_v2, %v454_v35 }
 0x280   :  { %v1146_v12 = vmax.f32 %v1144_v63, %v1145_v7  ;;  %v1160_v13 = vmax.f32 %v1158_v0, %v1159_v8  ;;  %v2059_v61 = vrot.slane %v1990_v2, %v462_v56 }
 0x281   :  { %v1153_v14 = vmax.f32 %v1151_v5, %v1152_v10  ;;  %v1167_v15 = vmax.f32 %v1165_v6, %v1166_v11 }
 0x283   :  { %v1358_v18 = vcombine.low %v1146_v12, %v1153_v14  ;;  %v1359_v20 = vcombine.low %v1160_v13, %v1167_v15 }
 0x285   :  { %v1366_v21 = vrot.slane %v1358_v18, %v2020_v17  ;;  %v1373_v22 = vrot.slane %v1359_v20, %v2020_v17 }
 0x286   :  { %v846_v26 = vpop.f32.mrb[8].mxu1  ;;  %v919_v28 = vpop.f32.mrb[16].mxu0 }
 0x287   :  { %v1374_v30 = vcombine.low %v1366_v21, %v1373_v22  ;;  %v848_v31 = vpop.f32.mrb[9].mxu1  ;;  %v921_v32 = vpop.f32.mrb[17].mxu0  ;;  %v847_v36 = vadd.f32 %v846_v26, %v1996_v25  ;;  %v920_v4 = vadd.f32 %v919_v28, %v2001_v1 }
 0x288   :  { %v850_v37 = vpop.f32.mrb[10].mxu1  ;;  %v923_v38 = vpop.f32.mrb[18].mxu0  ;;  %v849_v40 = vadd.f32 %v848_v31, %v2006_v34  ;;  %v922_v41 = vadd.f32 %v921_v32, %v2009_v39 }
 0x289   :  { %v1396_v3 = vrot.slane %v1374_v30, 7  ;;  %v851_v24 = vadd.f32 %v850_v37, %v1996_v25  ;;  %v924_v27 = vadd.f32 %v923_v38, %v2001_v1  ;;  %v852_v55 = vpop.f32.mrb[11].mxu1  ;;  %v925_v62 = vpop.f32.mrb[19].mxu0 }
 0x28a   :  { %v853_v49 = vadd.f32 %v852_v55, %v2006_v34  ;;  %v926_v42 = vadd.f32 %v925_v62, %v2009_v39 }
 0x28b   :  { %v1196_v48 = vmax.f32 %v847_v36, %v851_v24  ;;  %v1210_v43 = vmax.f32 %v920_v4, %v924_v27  ;;  %v1398_v54 = vsel %vm1397_vm1, %v1396_v3, %v1340_v9 }
 0x28c   :  { %v1203_v44 = vmax.f32 %v849_v40, %v853_v49  ;;  %v1217_v45 = vmax.f32 %v922_v41, %v926_v42  ;;  %v1400_v60 = vsel %vm1399_vm2, %v1396_v3, %v1398_v54 }
 0x28d   :  { %v1197_v50 = vrot.slane %v1196_v48, 4  ;;  %v1211_v47 = vrot.slane %v1210_v43, 4  ;;  %v1402_v52 = vsel %vm1401_vm3, %v1396_v3, %v1400_v60 }
 0x28e   :  { %v1204_v53 = vrot.slane %v1203_v44, 4  ;;  %v1218_v57 = vrot.slane %v1217_v45, 4  ;;  %v856_v58 = vpop.f32.mrb[12].mxu1  ;;  %v929_v59 = vpop.f32.mrb[20].mxu0  ;;  %v1404_v63 = vsel %vm1403_vm4, %v1396_v3, %v1402_v52 }
 0x28f   :  { %v1198_v0 = vmax.f32 %v1196_v48, %v1197_v50  ;;  %v1212_v19 = vmax.f32 %v1210_v43, %v1211_v47  ;;  %v857_v23 = vadd.f32 %v856_v58, %v1996_v25  ;;  %v930_v5 = vadd.f32 %v929_v59, %v2001_v1  ;;  %v858_v6 = vpop.f32.mrb[13].mxu1  ;;  %v931_v7 = vpop.f32.mrb[21].mxu0  ;;  %1414 = vst [vmem:[#allocation5] sm:$0xff] %v1404_v63 }
 0x290   :  { %v1205_v8 = vmax.f32 %v1203_v44, %v1204_v53  ;;  %v1219_v9 = vmax.f32 %v1217_v45, %v1218_v57  ;;  %v859_v10 = vadd.f32 %v858_v6, %v2006_v34  ;;  %v932_v11 = vadd.f32 %v931_v7, %v2009_v39  ;;  %v860_v12 = vpop.f32.mrb[14].mxu1  ;;  %v933_v2 = vpop.f32.mrb[22].mxu0 }
 0x291   :  { %v1199_v13 = vrot.slane %v1198_v0, 2  ;;  %v1213_v14 = vrot.slane %v1212_v19, 2  ;;  %v861_v15 = vadd.f32 %v860_v12, %v1996_v25  ;;  %v934_v16 = vadd.f32 %v933_v2, %v2001_v1  ;;  %v862_v18 = vpop.f32.mrb[15].mxu1  ;;  %v935_v20 = vpop.f32.mrb[23].mxu0 }
 0x292   :  { %v1206_v21 = vrot.slane %v1205_v8, 2  ;;  %v1220_v22 = vrot.slane %v1219_v9, 2  ;;  %v863_v26 = vadd.f32 %v862_v18, %v2006_v34  ;;  %v936_v28 = vadd.f32 %v935_v20, %v2009_v39 }
 0x293   :  { %v1200_v30 = vmax.f32 %v1198_v0, %v1199_v13  ;;  %v1214_v31 = vmax.f32 %v1212_v19, %v1213_v14  ;;  %v1252_v32 = vmax.f32 %v857_v23, %v861_v15  ;;  %v1266_v33 = vmax.f32 %v930_v5, %v934_v16 }
 0x294   :  { %v1207_v35 = vmax.f32 %v1205_v8, %v1206_v21  ;;  %v1221_v36 = vmax.f32 %v1219_v9, %v1220_v22  ;;  %v1259_v37 = vmax.f32 %v859_v10, %v863_v26  ;;  %v1273_v38 = vmax.f32 %v932_v11, %v936_v28 }
 0x295   :  { %v1201_v56 = vrot.slane %v1200_v30, 1  ;;  %v1215_v25 = vrot.slane %v1214_v31, 1  ;;  %v1253_v3 = vrot.slane %v1252_v32, 4  ;;  %v1267_v1 = vrot.slane %v1266_v33, 4 }
 0x296   :  { %v1208_v4 = vrot.slane %v1207_v35, 1  ;;  %v1222_v24 = vrot.slane %v1221_v36, 1  ;;  %v1260_v27 = vrot.slane %v1259_v37, 4  ;;  %v1274_v55 = vrot.slane %v1273_v38, 4  ;;  %v972_v62 = vpop.f32.mrb[16].mxu1  ;;  %v1045_v34 = vpop.f32.mrb[24].mxu0 }
 0x297   :  { %v1202_v40 = vmax.f32 %v1200_v30, %v1201_v56  ;;  %v1216_v39 = vmax.f32 %v1214_v31, %v1215_v25  ;;  %v1254_v41 = vmax.f32 %v1252_v32, %v1253_v3  ;;  %v1268_v49 = vmax.f32 %v1266_v33, %v1267_v1  ;;  %v974_v42 = vpop.f32.mrb[17].mxu1  ;;  %v1047_v48 = vpop.f32.mrb[25].mxu0 }
 0x298   :  { %v1209_v43 = vmax.f32 %v1207_v35, %v1208_v4  ;;  %v1223_v54 = vmax.f32 %v1221_v36, %v1222_v24  ;;  %v1261_v44 = vmax.f32 %v1259_v37, %v1260_v27  ;;  %v1275_v45 = vmax.f32 %v1273_v38, %v1274_v55  ;;  %v976_v60 = vpop.f32.mrb[18].mxu1  ;;  %v1049_v50 = vpop.f32.mrb[26].mxu0 }
 0x299   :  { %v1255_v47 = vrot.slane %v1254_v41, 2  ;;  %v1269_v52 = vrot.slane %v1268_v49, 2  ;;  %v973_v53 = vadd.f32 %v972_v62, %v2036_v29  ;;  %v1046_v57 = vadd.f32 %v1045_v34, %v2051_v46  ;;  %v978_v58 = vpop.f32.mrb[19].mxu1  ;;  %v1051_v59 = vpop.f32.mrb[27].mxu0 }
 0x29a   :  { %v1432_v63 = vcombine.low %v1202_v40, %v1209_v43  ;;  %v1433_v0 = vcombine.low %v1216_v39, %v1223_v54  ;;  %v1262_v19 = vrot.slane %v1261_v44, 2  ;;  %v1276_v23 = vrot.slane %v1275_v45, 2 }
 0x29b   :  { %v1256_v5 = vmax.f32 %v1254_v41, %v1255_v47  ;;  %v1270_v6 = vmax.f32 %v1268_v49, %v1269_v52  ;;  %v975_v7 = vadd.f32 %v974_v42, %v2055_v51  ;;  %v1048_v8 = vadd.f32 %v1047_v48, %v2059_v61 }
 0x29c   :  { %v2075_v9 = vrot.slane %v1432_v63, %v2020_v17  ;;  %v2078_v10 = vrot.slane %v1433_v0, %v2020_v17  ;;  %v1263_v11 = vmax.f32 %v1261_v44, %v1262_v19  ;;  %v1277_v12 = vmax.f32 %v1275_v45, %v1276_v23 }
 0x29d   :  { %v1257_v2 = vrot.slane %v1256_v5, 1  ;;  %v1271_v13 = vrot.slane %v1270_v6, 1  ;;  %v977_v14 = vadd.f32 %v976_v60, %v2036_v29  ;;  %v1050_v15 = vadd.f32 %v1049_v50, %v2051_v46 }
 0x29e   :  { %v1448_v16 = vcombine.low %v2075_v9, %v2078_v10  ;;  %v1264_v18 = vrot.slane %v1263_v11, 1  ;;  %v1278_v20 = vrot.slane %v1277_v12, 1  ;;  %v979_v21 = vadd.f32 %v978_v58, %v2055_v51  ;;  %v982_v22 = vpop.f32.mrb[20].mxu1  ;;  %v1055_v26 = vpop.f32.mrb[28].mxu0 }
 0x29f   :  { %v1258_v28 = vmax.f32 %v1256_v5, %v1257_v2  ;;  %v1272_v30 = vmax.f32 %v1270_v6, %v1271_v13  ;;  %v1112_v31 = vmax.f32 %v973_v53, %v977_v14  ;;  %v1126_v32 = vmax.f32 %v1046_v57, %v1050_v15  ;;  %v984_v33 = vpop.f32.mrb[21].mxu1  ;;  %v1057_v35 = vpop.f32.mrb[29].mxu0 }
 0x2a0   :  { %v1265_v36 = vmax.f32 %v1263_v11, %v1264_v18  ;;  %v1279_v37 = vmax.f32 %v1277_v12, %v1278_v20  ;;  %v1119_v38 = vmax.f32 %v975_v7, %v979_v21  ;;  %v1052_v56 = vadd.f32 %v1051_v59, %v2059_v61  ;;  %v986_v25 = vpop.f32.mrb[22].mxu1  ;;  %v1059_v3 = vpop.f32.mrb[30].mxu0 }
 0x2a1   :  { %v1113_v1 = vrot.slane %v1112_v31, 4  ;;  %v1127_v4 = vrot.slane %v1126_v32, 4  ;;  %v983_v24 = vadd.f32 %v982_v22, %v2036_v29  ;;  %v1056_v27 = vadd.f32 %v1055_v26, %v2051_v46  ;;  %v988_v55 = vpop.f32.mrb[23].mxu1  ;;  %v1061_v62 = vpop.f32.mrb[31].mxu0 }
 0x2a2   :  { %v1466_v34 = vcombine.low %v1258_v28, %v1265_v36  ;;  %v1467_v40 = vcombine.low %v1272_v30, %v1279_v37  ;;  %v1120_v39 = vrot.slane %v1119_v38, 4  ;;  %v1133_v41 = vmax.f32 %v1048_v8, %v1052_v56 }
 0x2a3   :  { %v1114_v49 = vmax.f32 %v1112_v31, %v1113_v1  ;;  %v1128_v42 = vmax.f32 %v1126_v32, %v1127_v4  ;;  %v985_v48 = vadd.f32 %v984_v33, %v2055_v51  ;;  %v1058_v43 = vadd.f32 %v1057_v35, %v2059_v61 }
 0x2a4   :  { %v1474_v54 = vrot.slane %v1466_v34, %v2020_v17  ;;  %v1481_v44 = vrot.slane %v1467_v40, %v2020_v17  ;;  %v1121_v45 = vmax.f32 %v1119_v38, %v1120_v39  ;;  %v1134_v60 = vrot.slane %v1133_v41, 4 }
 0x2a5   :  { %v1115_v50 = vrot.slane %v1114_v49, 2  ;;  %v1129_v47 = vrot.slane %v1128_v42, 2  ;;  %v987_v52 = vadd.f32 %v986_v25, %v2036_v29  ;;  %v1060_v53 = vadd.f32 %v1059_v3, %v2051_v46 }
 0x2a6   :  { %v1482_v57 = vcombine.low %v1474_v54, %v1481_v44  ;;  %v1122_v58 = vrot.slane %v1121_v45, 2  ;;  %v1135_v59 = vmax.f32 %v1133_v41, %v1134_v60  ;;  %v989_v63 = vadd.f32 %v988_v55, %v2055_v51  ;;  %v992_v0 = vpop.f32.mrb[24].mxu1  ;;  %v1065_v19 = vpop.f32.mrb[32].mxu0 }
 0x2a7   :  { %v1116_v23 = vmax.f32 %v1114_v49, %v1115_v50  ;;  %v1130_v5 = vmax.f32 %v1128_v42, %v1129_v47  ;;  %v1168_v6 = vmax.f32 %v983_v24, %v987_v52  ;;  %v1182_v7 = vmax.f32 %v1056_v27, %v1060_v53  ;;  %v994_v8 = vpop.f32.mrb[25].mxu1  ;;  %v1067_v11 = vpop.f32.mrb[33].mxu0 }
 0x2a8   :  { %v2095_v12 = vrot.slane %v1482_v57, 7  ;;  %v1123_v2 = vmax.f32 %v1121_v45, %v1122_v58  ;;  %v1136_v13 = vrot.slane %v1135_v59, 2  ;;  %v1175_v14 = vmax.f32 %v985_v48, %v989_v63  ;;  %v996_v15 = vpop.f32.mrb[26].mxu1  ;;  %v1069_v18 = vpop.f32.mrb[34].mxu0 }
 0x2a9   :  { %v1117_v20 = vrot.slane %v1116_v23, 1  ;;  %v1131_v21 = vrot.slane %v1130_v5, 1  ;;  %v1169_v22 = vrot.slane %v1168_v6, 4  ;;  %v1183_v26 = vrot.slane %v1182_v7, 4  ;;  %v998_v28 = vpop.f32.mrb[27].mxu1  ;;  %v1071_v30 = vpop.f32.mrb[35].mxu0 }
 0x2aa   :  { %v1124_v31 = vrot.slane %v1123_v2, 1  ;;  %v1137_v32 = vmax.f32 %v1135_v59, %v1136_v13  ;;  %v1176_v33 = vrot.slane %v1175_v14, 4  ;;  %v1062_v35 = vadd.f32 %v1061_v62, %v2059_v61 }
 0x2ab   :  { %v1118_v36 = vmax.f32 %v1116_v23, %v1117_v20  ;;  %v1132_v37 = vmax.f32 %v1130_v5, %v1131_v21  ;;  %v1170_v38 = vmax.f32 %v1168_v6, %v1169_v22  ;;  %v1184_v56 = vmax.f32 %v1182_v7, %v1183_v26 }
 0x2ac   :  { %v1125_v25 = vmax.f32 %v1123_v2, %v1124_v31  ;;  %v1138_v3 = vrot.slane %v1137_v32, 1  ;;  %v1177_v1 = vmax.f32 %v1175_v14, %v1176_v33  ;;  %v1189_v4 = vmax.f32 %v1058_v43, %v1062_v35 }
 0x2ad   :  { %v1171_v24 = vrot.slane %v1170_v38, 2  ;;  %v1185_v27 = vrot.slane %v1184_v56, 2  ;;  %v993_v55 = vadd.f32 %v992_v0, %v2036_v29  ;;  %v1066_v34 = vadd.f32 %v1065_v19, %v2051_v46 }
 0x2ae   :  { %v1341_v40 = vcombine.low %v1118_v36, %v1125_v25  ;;  %v1139_v39 = vmax.f32 %v1137_v32, %v1138_v3  ;;  %v1178_v41 = vrot.slane %v1177_v1, 2  ;;  %v1190_v49 = vrot.slane %v1189_v4, 4  ;;  %v1002_v42 = vpop.f32.mrb[28].mxu1 }
 0x2af   :  { %v1172_v62 = vmax.f32 %v1170_v38, %v1171_v24  ;;  %v1186_v48 = vmax.f32 %v1184_v56, %v1185_v27  ;;  %v995_v54 = vadd.f32 %v994_v8, %v2055_v51  ;;  %v1068_v44 = vadd.f32 %v1067_v11, %v2059_v61  ;;  %v1004_v45 = vpop.f32.mrb[29].mxu1 }
 0x2b0   :  { %v2103_v43 = vrot.slane %v1341_v40, %v2020_v17  ;;  %v1342_v60 = vcombine.low %v1132_v37, %v1139_v39  ;;  %v1179_v50 = vmax.f32 %v1177_v1, %v1178_v41  ;;  %v1191_v47 = vmax.f32 %v1189_v4, %v1190_v49  ;;  %v1006_v52 = vpop.f32.mrb[30].mxu1 }
 0x2b1   :  { %v1173_v53 = vrot.slane %v1172_v62, 1  ;;  %v1187_v57 = vrot.slane %v1186_v48, 1  ;;  %v997_v58 = vadd.f32 %v996_v15, %v2036_v29  ;;  %v1070_v59 = vadd.f32 %v1069_v18, %v2051_v46  ;;  %v1008_v63 = vpop.f32.mrb[31].mxu1 }
 0x2b2   :  { %v2108_v0 = vrot.slane %v1342_v60, %v2020_v17  ;;  %v1180_v19 = vrot.slane %v1179_v50, 1  ;;  %v1192_v23 = vrot.slane %v1191_v47, 2  ;;  %v999_v5 = vadd.f32 %v998_v28, %v2055_v51 }
 0x2b3   :  { %v1174_v6 = vmax.f32 %v1172_v62, %v1173_v53  ;;  %v1188_v7 = vmax.f32 %v1186_v48, %v1187_v57  ;;  %v1224_v8 = vmax.f32 %v993_v55, %v997_v58  ;;  %v1238_v11 = vmax.f32 %v1066_v34, %v1070_v59 }
 0x2b4   :  { %v1357_v2 = vcombine.low %v2103_v43, %v2108_v0  ;;  %v1181_v13 = vmax.f32 %v1179_v50, %v1180_v19  ;;  %v1193_v14 = vmax.f32 %v1191_v47, %v1192_v23  ;;  %v1231_v15 = vmax.f32 %v995_v54, %v999_v5 }
 0x2b5   :  { %v1225_v20 = vrot.slane %v1224_v8, 4  ;;  %v1239_v18 = vrot.slane %v1238_v11, 4  ;;  %v1072_v21 = vadd.f32 %v1071_v30, %v2059_v61  ;;  %v1003_v22 = vadd.f32 %v1002_v42, %v2036_v29 }
 0x2b6   :  { %v1375_v26 = vcombine.low %v1174_v6, %v1181_v13  ;;  %v1194_v31 = vrot.slane %v1193_v14, 1  ;;  %v1232_v32 = vrot.slane %v1231_v15, 4  ;;  %v1005_v28 = vadd.f32 %v1004_v45, %v2055_v51  ;;  %v1075_v33 = vpop.f32.mrb[32].mxu1 }
 0x2b7   :  { %v1226_v35 = vmax.f32 %v1224_v8, %v1225_v20  ;;  %v1240_v36 = vmax.f32 %v1238_v11, %v1239_v18  ;;  %v1245_v37 = vmax.f32 %v1068_v44, %v1072_v21  ;;  %v1007_v38 = vadd.f32 %v1006_v52, %v2036_v29  ;;  %v1077_v56 = vpop.f32.mrb[33].mxu1 }
 0x2b8   :  { %v1383_v25 = vrot.slane %v1375_v26, %v2020_v17  ;;  %v1195_v3 = vmax.f32 %v1193_v14, %v1194_v31  ;;  %v1233_v1 = vmax.f32 %v1231_v15, %v1232_v32  ;;  %v1009_v30 = vadd.f32 %v1008_v63, %v2055_v51  ;;  %v1079_v4 = vpop.f32.mrb[34].mxu1 }
 0x2b9   :  { %v1227_v24 = vrot.slane %v1226_v35, 2  ;;  %v1241_v27 = vrot.slane %v1240_v36, 2  ;;  %v1246_v55 = vrot.slane %v1245_v37, 4  ;;  %v1280_v34 = vmax.f32 %v1003_v22, %v1007_v38  ;;  %v1081_v40 = vpop.f32.mrb[35].mxu1 }
 0x2ba   :  { %v1376_v39 = vcombine.low %v1188_v7, %v1195_v3  ;;  %v1234_v41 = vrot.slane %v1233_v1, 2  ;;  %v1287_v49 = vmax.f32 %v1005_v28, %v1009_v30  ;;  %v1076_v42 = vadd.f32 %v1075_v33, %v2051_v46 }
 0x2bb   :  { %v1228_v62 = vmax.f32 %v1226_v35, %v1227_v24  ;;  %v1242_v29 = vmax.f32 %v1240_v36, %v1241_v27  ;;  %v1247_v48 = vmax.f32 %v1245_v37, %v1246_v55  ;;  %v1281_v54 = vrot.slane %v1280_v34, 4 }
 0x2bc   :  { %v1390_v44 = vrot.slane %v1376_v39, %v2020_v17  ;;  %v1235_v45 = vmax.f32 %v1233_v1, %v1234_v41  ;;  %v1288_v60 = vrot.slane %v1287_v49, 4  ;;  %v1078_v51 = vadd.f32 %v1077_v56, %v2059_v61 }
 0x2bd   :  { %v1229_v50 = vrot.slane %v1228_v62, 1  ;;  %v1243_v47 = vrot.slane %v1242_v29, 1  ;;  %v1248_v52 = vrot.slane %v1247_v48, 2  ;;  %v1282_v53 = vmax.f32 %v1280_v34, %v1281_v54 }
 0x2be   :  { %v1391_v57 = vcombine.low %v1383_v25, %v1390_v44  ;;  %v1236_v58 = vrot.slane %v1235_v45, 1  ;;  %v1289_v59 = vmax.f32 %v1287_v49, %v1288_v60  ;;  %v1080_v63 = vadd.f32 %v1079_v4, %v2051_v46 }
 0x2bf   :  { %v1230_v19 = vmax.f32 %v1228_v62, %v1229_v50  ;;  %v1244_v23 = vmax.f32 %v1242_v29, %v1243_v47  ;;  %v1249_v5 = vmax.f32 %v1247_v48, %v1248_v52  ;;  %v1283_v6 = vrot.slane %v1282_v53, 2 }
 0x2c0   :  { %v1407_v7 = vrot.slane %v1391_v57, 7  ;;  %v1237_v8 = vmax.f32 %v1235_v45, %v1236_v58  ;;  %v1290_v11 = vrot.slane %v1289_v59, 2  ;;  %v1294_v13 = vmax.f32 %v1076_v42, %v1080_v63 }
 0x2c1   :  { %v1250_v14 = vrot.slane %v1249_v5, 1  ;;  %v1284_v15 = vmax.f32 %v1282_v53, %v1283_v6  ;;  %v1082_v20 = vadd.f32 %v1081_v40, %v2059_v61  ;;  %v1503_v18 = vsel %vm1397_vm1, %v2095_v12, %v1448_v16 }
 0x2c2   :  { %v1449_v21 = vcombine.low %v1230_v19, %v1237_v8  ;;  %v1291_v46 = vmax.f32 %v1289_v59, %v1290_v11  ;;  %v1295_v22 = vrot.slane %v1294_v13, 4  ;;  %v1408_v26 = vsel %vm1397_vm1, %v1407_v7, %v1357_v2 }
 0x2c3   :  { %v1251_v31 = vmax.f32 %v1249_v5, %v1250_v14  ;;  %v1285_v32 = vrot.slane %v1284_v15, 1  ;;  %v1301_v28 = vmax.f32 %v1078_v51, %v1082_v20  ;;  %v1409_v33 = vsel %vm1399_vm2, %v1407_v7, %v1408_v26 }
 0x2c4   :  { %v1457_v61 = vrot.slane %v1449_v21, %v2020_v17  ;;  %v1292_v35 = vrot.slane %v1291_v46, 1  ;;  %v1296_v9 = vmax.f32 %v1294_v13, %v1295_v22  ;;  %v1410_v10 = vsel %vm1401_vm3, %v1407_v7, %v1409_v33 }
 0x2c5   :  { %v1450_v16 = vcombine.low %v1244_v23, %v1251_v31  ;;  %v1286_v36 = vmax.f32 %v1284_v15, %v1285_v32  ;;  %v1302_v37 = vrot.slane %v1301_v28, 4  ;;  %v1411_v38 = vsel %vm1403_vm4, %v1407_v7, %v1410_v10 }
 0x2c6   :  { %v1293_v56 = vmax.f32 %v1291_v46, %v1292_v35  ;;  %v1297_v43 = vrot.slane %v1296_v9, 2  ;;  %1415 = vst [vmem:[#allocation5 + $0x8] sm:$0xff] %v1411_v38  ;;  %v1504_v0 = vsel %vm1399_vm2, %v2095_v12, %v1503_v18 }
 0x2c7   :  { %v1464_v2 = vrot.slane %v1450_v16, %v2020_v17  ;;  %v1303_v25 = vmax.f32 %v1301_v28, %v1302_v37  ;;  %v1505_v3 = vsel %vm1401_vm3, %v2095_v12, %v1504_v0 }
 0x2c8   :  { %v1483_v1 = vcombine.low %v1286_v36, %v1293_v56  ;;  %v1298_v30 = vmax.f32 %v1296_v9, %v1297_v43  ;;  %v1506_v4 = vsel %vm1403_vm4, %v2095_v12, %v1505_v3 }
 0x2c9   :  { %v1465_v24 = vcombine.low %v1457_v61, %v1464_v2  ;;  %v1304_v27 = vrot.slane %v1303_v25, 2  ;;  %1516 = vst [vmem:[#allocation5 + $0x10] sm:$0xff] %v1506_v4 }
 0x2ca   :  { %v1299_v55 = vrot.slane %v1298_v30, 1  ;;  %v1491_v42 = vrot.slane %v1483_v1, %v2020_v17 }
 0x2cb   :  { %v1305_v34 = vmax.f32 %v1303_v25, %v1304_v27 }
 0x2cc   :  { %v1300_v40 = vmax.f32 %v1298_v30, %v1299_v55 }
 0x2cd   :  { %v1306_v39 = vrot.slane %v1305_v34, 1 }
 0x2cf   :  { %v1307_v41 = vmax.f32 %v1305_v34, %v1306_v39 }
 0x2d1   :  { %v1484_v49 = vcombine.low %v1300_v40, %v1307_v41 }
 0x2d3   :  { %v1498_v62 = vrot.slane %v1484_v49, %v2020_v17 }
 0x2d5   :  { %v1499_v29 = vcombine.low %v1491_v42, %v1498_v62 }
 0x2d7   :  { %v1509_v48 = vrot.slane %v1499_v29, 7 }
 0x2d9   :  { %v1510_v54 = vsel %vm1397_vm1, %v1509_v48, %v1465_v24 }
 0x2da   :  { %v1511_v12 = vsel %vm1399_vm2, %v1509_v48, %v1510_v54 }
 0x2db   :  { %v1512_v44 = vsel %vm1401_vm3, %v1509_v48, %v1511_v12 }
 0x2dc   :  { %v1513_v45 = vsel %vm1403_vm4, %v1509_v48, %v1512_v44 }
 0x2dd   :  { %1517 = vst [vmem:[#allocation5 + $0x18] sm:$0xff] %v1513_v45 }
 0x2de   :  { %1703 = shalt.err (!%p1700_p12)
}
 0x2df   :  { %s1704_s25 = scalar_lea.hbm %s2170_s8, 512 }
 0x2e0   :  { %p1705_p13 = scmp.ne.s32.totalorder %s2170_s8, %s1704_s25  ;;  %p1708_p0 = scmp.lt.u32.totalorder %s1704_s25, %s2170_s8 }
 0x2e2   :  { %p1710_p1 = pnand %p1708_p0, %p1705_p13 }
 0x2e4   :  { %1713 = shalt.err (!%p1710_p1)
}
 0x2e5   :  { %1527 = dma.vmem_to_hbm [thread:$0]  %s1525_s22, 512, %s2170_s8, [#allocation4]  }
 0x2e6   :  { %1716 = dma.done.wait [#allocation4], 512  }
 0x2e7   :  { %1717 = vsyncadd [#allocation4], 4294966784 }
 0x2e8   :  { %1531 = vsyncpa [#allocation3], 1 }
 0x2e9   :  { %1532 = vsyncpa [#allocation4], 1 }

</bundles_post_ra>
